<compile_context>
chip_gen: v7x
topology: tpu7x:2x2x1
jax: 0.10.0
libtpu: 0.0.40
codegen_flags: <defaults>
</compile_context>

<pallas_src>
import functools

import jax
import jax.numpy as jnp
from jax.experimental import pallas as pl
from jax.experimental.pallas import tpu as pltpu


def _round_up(x, m):
    return ((x + m - 1) // m) * m


def _supcon_tile_body(pos_w, a_ref, b_ref, out_ref, a_scaled_ref, stats_ref,
                      *, inv_temp, scale, n_valid, tm, tn, n_col_blocks,
                      has_pad, compute_dtype):
    """Online-softmax update for one [TM, TN] logits tile.

    stats_ref columns: 0 = running max m, 1 = exp-sum Z (self/pad excluded),
                       2 = sum(pos * logits), 3 = sum(pos).  Cols 4..7 spare.
    """
    i = pl.program_id(0)
    j = pl.program_id(1)

    @pl.when(j == 0)
    def _():
        # Hoist the 1/T anchor scaling out of the reduction (j) loop: the A
        # tile is constant across j, so scale/cast it once into VMEM scratch.
        a_scaled_ref[...] = (a_ref[...].astype(jnp.float32)
                             * jnp.float32(inv_temp)).astype(compute_dtype)
        stats_ref[...] = jnp.zeros(stats_ref.shape, jnp.float32)
        stats_ref[:, 0:1] = jnp.full((tm, 1), -jnp.inf, jnp.float32)

    # logits = (A / T) @ B^T  -- contract last dims directly, no transpose.
    logits = jax.lax.dot_general(
        a_scaled_ref[...], b_ref[...],
        dimension_numbers=(((1,), (1,)), ((), ())),
        preferred_element_type=jnp.float32)

    neg_inf = jnp.float32(-jnp.inf)

    def _update(max_src, exp_src, pos):
        m_old = stats_ref[:, 0:1]
        z_old = stats_ref[:, 1:2]
        s_old = stats_ref[:, 2:3]
        p_old = stats_ref[:, 3:4]
        m_new = jnp.maximum(m_old, jnp.max(max_src, axis=1, keepdims=True))
        alpha = jnp.exp(m_old - m_new)
        e_sum = jnp.sum(jnp.exp(exp_src - m_new), axis=1, keepdims=True)
        stats_ref[:, 0:1] = m_new
        stats_ref[:, 1:2] = alpha * z_old + e_sum
        # TODO(synk): if XLU becomes the binding slot, fold these two row-sums
        # into one MXU dot against a ones [TN, 2] operand.
        stats_ref[:, 2:3] = s_old + jnp.sum(pos * logits, axis=1, keepdims=True)
        stats_ref[:, 3:4] = p_old + jnp.sum(pos, axis=1, keepdims=True)

    # Mask construction only runs on tiles that actually need it: the diagonal
    # tile (self-contrast removal) and, when the problem is padded, the last
    # column block (padded-column removal).  Interior off-diagonal tiles take
    # the unmasked fast path, skipping iota/compare/select over TM*TN elems.
    need_mask = i == j
    if has_pad:
        need_mask = jnp.logical_or(need_mask, j == n_col_blocks - 1)

    @pl.when(need_mask)
    def _():
        row_ids = i * tm + jax.lax.broadcasted_iota(jnp.int32, (tm, tn), 0)
        col_ids = j * tn + jax.lax.broadcasted_iota(jnp.int32, (tm, tn), 1)
        not_self = row_ids != col_ids
        if has_pad:
            # Padded-column guard stays on the last column block so padded
            # labels (0) can never alias a real label.
            col_valid = col_ids < n_valid
            lmask = jnp.logical_and(col_valid, not_self)
            # Row max over valid columns (self included, matching torch); the
            # choice of max cancels exactly in log_prob.
            max_src = jnp.where(col_valid, logits, neg_inf)
        else:
            lmask = not_self
            max_src = logits
        _update(max_src,
                jnp.where(lmask, logits, neg_inf),
                jnp.where(lmask, pos_w, 0.0))

    @pl.when(jnp.logical_not(need_mask))
    def _():
        _update(logits, logits, pos_w)

    @pl.when(j == n_col_blocks - 1)
    def _():
        m = stats_ref[:, 0:1]
        z = stats_ref[:, 1:2]
        s = stats_ref[:, 2:3]
        p = stats_ref[:, 3:4]
        log_z = m + jnp.log(z)
        row_idx = i * tm + jax.lax.broadcasted_iota(jnp.int32, (tm, 1), 0)
        # Guard padded rows and empty-positive rows (PyTorch would give NaN on
        # the latter; a zero contribution is the safe behaviour here).
        valid_row = jnp.logical_and(row_idx < n_valid, p > 0.0)
        mean_lpp = jnp.where(valid_row, (s - p * log_z) / p, 0.0)
        out_ref[...] = jnp.float32(scale) * mean_lpp


def _supcon_labels_kernel(lab_row_ref, lab_col_ref, a_ref, b_ref, out_ref,
                          a_scaled_ref, stats_ref, **kw):
    # Positive mask rebuilt per tile from O(N) label vectors (no NxN in HBM).
    pos_w = (lab_row_ref[...] == lab_col_ref[...]).astype(jnp.float32)
    _supcon_tile_body(pos_w, a_ref, b_ref, out_ref, a_scaled_ref, stats_ref,
                      **kw)


def _supcon_mask_kernel(mask_ref, a_ref, b_ref, out_ref,
                        a_scaled_ref, stats_ref, **kw):
    # User-supplied (possibly asymmetric / weighted) mask path: mask lives in
    # HBM as bf16 (0/1 values are exact) and is upcast per tile.
    _supcon_tile_body(mask_ref[...].astype(jnp.float32), a_ref, b_ref, out_ref,
                      a_scaled_ref, stats_ref, **kw)


def _vmem_bytes_estimate(tm, tn, dim, feat_bytes, use_user_mask):
    """Rough double-buffered working-set size for one grid step."""
    lane = 128
    dpad = _round_up(dim, lane)
    est = 2 * tm * dpad * feat_bytes            # anchor tiles (double-buffered)
    est += 2 * tn * dpad * feat_bytes           # contrast tiles (double-buffered)
    est += 2 * tm * lane * 4                    # (tm,1) output block, lane-padded
    est += tm * dpad * feat_bytes               # scaled-anchor scratch
    est += tm * lane * 4                        # merged stats scratch
    if use_user_mask:
        est += 2 * tm * _round_up(tn, lane) * 2     # bf16 mask tiles
    else:
        est += 2 * (tm * lane * 4 + 8 * _round_up(tn, lane) * 4)  # label vecs
    return est


def supcon_loss(features, labels=None, mask=None,
                temperature=0.07, contrast_mode='all', base_temperature=0.07,
                block=512, use_bf16_matmul=True):
    """Pallas implementation of SupConLoss.forward (contrast_mode='all').

    features: [bsz, n_views, ...] float
    labels:   [bsz] int (optional)
    mask:     [bsz, bsz] float (optional; mutually exclusive with labels)
    use_bf16_matmul: bf16 MXU operands + f32 accumulation (perf path); set
        False for bit-faithful f32 matmul.
    returns:  scalar float32 loss
    """
    if features.ndim < 3:
        raise ValueError('`features` needs to be [bsz, n_views, ...]')
    if features.ndim > 3:
        features = features.reshape(features.shape[0], features.shape[1], -1)
    if contrast_mode != 'all':
        # TODO(synk): contrast_mode='one' (anchor = view 0 only) not wired up.
        raise ValueError('only contrast_mode="all" is implemented')
    if block % 128 != 0:
        raise ValueError('block must be a multiple of 128')
    if labels is not None and mask is not None:
        raise ValueError('Cannot define both `labels` and `mask`')

    bsz, n_views, dim = features.shape
    n = bsz * n_views
    use_labels = mask is None

    # ----- label / mask preparation (cheap O(N) glue, plain JAX) -----
    if labels is None and mask is None:
        lab_vec = jnp.arange(bsz, dtype=jnp.int32)          # SimCLR: eye(bsz)
    elif labels is not None:
        labels = jnp.asarray(labels).reshape(-1)
        if labels.shape[0] != bsz:
            raise ValueError('Num of labels does not match num of features')
        lab_vec = labels.astype(jnp.int32)
    else:
        lab_vec = None

    compute_dtype = jnp.bfloat16 if use_bf16_matmul else jnp.float32
    feat_bytes = 2 if use_bf16_matmul else 4

    # torch.cat(torch.unbind(features, dim=1), dim=0) == views-major flatten.
    contrast_feature = jnp.transpose(features, (1, 0, 2)).reshape(n, dim)
    contrast_feature = contrast_feature.astype(compute_dtype)

    # ----- tiling: largest lane-aligned tile fitting the VMEM budget of the
    # most restrictive generation (v7x: 64 MiB physical) -----
    budget = 48 * 1024 * 1024
    tm = block if n > block else _round_up(n, 128)
    while tm > 128 and _vmem_bytes_estimate(tm, tm, dim, feat_bytes,
                                            not use_labels) > budget:
        tm = max(128, ((tm // 2) // 128) * 128)
    tn = tm
    n_pad = _round_up(n, tm)
    pad = n_pad - n            # always < tn, so every column block has a
    gi = n_pad // tm           # valid column (online-softmax invariant).
    gj = n_pad // tn

    feat = (jnp.pad(contrast_feature, ((0, pad), (0, 0)))
            if pad else contrast_feature)

    est = _vmem_bytes_estimate(tm, tn, dim, feat_bytes, not use_labels)
    vmem_limit = int(min(64 * 1024 * 1024,
                         max(32 * 1024 * 1024, int(est * 1.25) + (4 << 20))))

    static_kw = dict(
        inv_temp=1.0 / float(temperature),
        scale=-(float(temperature) / float(base_temperature)),
        n_valid=n, tm=tm, tn=tn, n_col_blocks=gj, has_pad=pad > 0,
        compute_dtype=compute_dtype)

    scratch = [pltpu.VMEM((tm, dim), compute_dtype),   # scaled anchor tile
               pltpu.VMEM((tm, 8), jnp.float32)]       # merged m/Z/s/p stats
    out_spec = pl.BlockSpec((tm, 1), lambda i, j: (i, 0))
    feat_a_spec = pl.BlockSpec((tm, dim), lambda i, j: (i, 0))
    feat_b_spec = pl.BlockSpec((tn, dim), lambda i, j: (j, 0))
    cparams = pltpu.CompilerParams(
        dimension_semantics=("parallel", "arbitrary"),
        vmem_limit_bytes=vmem_limit)

    if use_labels:
        lab_rep = jnp.tile(lab_vec, n_views)                # length N
        if pad:
            lab_rep = jnp.pad(lab_rep, (0, pad))            # guarded in-kernel
        lab_row = lab_rep.reshape(n_pad, 1)
        lab_col = lab_rep.reshape(1, n_pad)
        out_rows = pl.pallas_call(
            functools.partial(_supcon_labels_kernel, **static_kw),
            out_shape=jax.ShapeDtypeStruct((n_pad, 1), jnp.float32),
            grid_spec=pltpu.PrefetchScalarGridSpec(
                num_scalar_prefetch=0,
                grid=(gi, gj),
                in_specs=[
                    pl.BlockSpec((tm, 1), lambda i, j: (i, 0)),   # row labels
                    pl.BlockSpec((1, tn), lambda i, j: (0, j)),   # col labels
                    feat_a_spec,
                    feat_b_spec,
                ],
                out_specs=out_spec,
                scratch_shapes=scratch),
            compiler_params=cparams,
        )(lab_row, lab_col, feat, feat)
    else:
        base_mask = jnp.asarray(mask, dtype=jnp.float32)
        big_mask = jnp.tile(base_mask, (n_views, n_views)).astype(jnp.bfloat16)
        if pad:
            big_mask = jnp.pad(big_mask, ((0, pad), (0, pad)))
        out_rows = pl.pallas_call(
            functools.partial(_supcon_mask_kernel, **static_kw),
            out_shape=jax.ShapeDtypeStruct((n_pad, 1), jnp.float32),
            grid_spec=pltpu.PrefetchScalarGridSpec(
                num_scalar_prefetch=0,
                grid=(gi, gj),
                in_specs=[
                    pl.BlockSpec((tm, tn), lambda i, j: (i, j)),  # mask tile
                    feat_a_spec,
                    feat_b_spec,
                ],
                out_specs=out_spec,
                scratch_shapes=scratch),
            compiler_params=cparams,
        )(big_mask, feat, feat)

    return jnp.sum(out_rows) / n


def _supcon_loss_ref(features, labels=None, mask=None,
                     temperature=0.07, base_temperature=0.07):
    """Pure-JAX reference matching the PyTorch module (contrast_mode='all')."""
    bsz, n_views, dim = features.shape
    if labels is None and mask is None:
        base_mask = jnp.eye(bsz, dtype=jnp.float32)
    elif labels is not None:
        lab = jnp.asarray(labels).reshape(-1, 1)
        base_mask = (lab == lab.T).astype(jnp.float32)
    else:
        base_mask = jnp.asarray(mask, dtype=jnp.float32)
    cf = jnp.transpose(features, (1, 0, 2)).reshape(bsz * n_views, dim)
    cf = cf.astype(jnp.float32)
    adc = (cf @ cf.T) / temperature
    logits = adc - jnp.max(adc, axis=1, keepdims=True)
    n = bsz * n_views
    logits_mask = 1.0 - jnp.eye(n, dtype=jnp.float32)
    m = jnp.tile(base_mask, (n_views, n_views)) * logits_mask
    exp_logits = jnp.exp(logits) * logits_mask
    log_prob = logits - jnp.log(exp_logits.sum(1, keepdims=True))
    mlpp = (m * log_prob).sum(1) / m.sum(1)
    loss = -(temperature / base_temperature) * mlpp
    return loss.reshape(n_views, bsz).mean()


if __name__ == "__main__":
    key = jax.random.PRNGKey(0)
    k1, k2, k3, k4 = jax.random.split(key, 4)

    # --- Tests 1-3: exact-precision (f32 matmul) path, single tile ---
    bsz, n_views, dim = 8, 2, 32
    feats = jax.random.normal(k1, (bsz, n_views, dim), dtype=jnp.float32)
    feats = feats / jnp.linalg.norm(feats, axis=-1, keepdims=True)
    labels = jax.random.randint(k2, (bsz,), 0, 4, dtype=jnp.int32)

    loss1 = jax.block_until_ready(
        supcon_loss(feats, labels=labels, use_bf16_matmul=False))
    ref1 = _supcon_loss_ref(feats, labels=labels)
    assert jnp.isfinite(loss1), "loss is not finite"
    assert jnp.allclose(loss1, ref1, rtol=1e-5, atol=1e-5), (loss1, ref1)

    loss2 = jax.block_until_ready(supcon_loss(feats, use_bf16_matmul=False))
    ref2 = _supcon_loss_ref(feats)
    assert jnp.allclose(loss2, ref2, rtol=1e-5, atol=1e-5), (loss2, ref2)

    usr_mask = (labels[:, None] == labels[None, :]).astype(jnp.float32)
    loss3 = jax.block_until_ready(
        supcon_loss(feats, mask=usr_mask, use_bf16_matmul=False))
    assert jnp.allclose(loss3, ref1, rtol=1e-5, atol=1e-5), (loss3, ref1)

    # --- Test 4: multi-tile + padding (N=320, block=128 -> 3x3 grid), f32 ---
    bsz2, nv2, d2 = 160, 2, 64
    feats2 = jax.random.normal(k3, (bsz2, nv2, d2), dtype=jnp.float32)
    feats2 = feats2 / jnp.linalg.norm(feats2, axis=-1, keepdims=True)
    labels2 = jax.random.randint(k4, (bsz2,), 0, 10, dtype=jnp.int32)
    loss4 = jax.block_until_ready(
        supcon_loss(feats2, labels=labels2, block=128, use_bf16_matmul=False))
    ref4 = _supcon_loss_ref(feats2, labels=labels2)
    assert jnp.isfinite(loss4), "loss is not finite"
    assert jnp.allclose(loss4, ref4, rtol=1e-5, atol=1e-5), (loss4, ref4)

    # --- Test 5: default perf path (bf16 MXU operands, f32 accumulate) ---
    loss5 = jax.block_until_ready(supcon_loss(feats2, labels=labels2))
    assert jnp.isfinite(loss5), "loss is not finite"
    assert jnp.allclose(loss5, ref4, rtol=5e-2, atol=5e-2), (loss5, ref4)

    # --- Test 6: user-mask path, multi-tile, bf16 mask stream ---
    usr_mask2 = (labels2[:, None] == labels2[None, :]).astype(jnp.float32)
    loss6 = jax.block_until_ready(
        supcon_loss(feats2, mask=usr_mask2, block=128, use_bf16_matmul=False))
    assert jnp.allclose(loss6, ref4, rtol=1e-5, atol=1e-5), (loss6, ref4)

    print("KERNEL_OK")
</pallas_src>

<mosaic_0001>
module attributes {stable_mosaic.version = 11 : i64} {
  func.func @_supcon_labels_kernel(%arg0: i32, %arg1: i32, %arg2: memref<128x1xi32, #tpu.memory_space<vmem>>, %arg3: memref<1x128xi32, #tpu.memory_space<vmem>>, %arg4: memref<128x32xf32, #tpu.memory_space<vmem>>, %arg5: memref<128x32xf32, #tpu.memory_space<vmem>>, %arg6: memref<128x1xf32, #tpu.memory_space<vmem>>, %arg7: memref<128x32xf32, #tpu.memory_space<vmem>>, %arg8: memref<128x8xf32, #tpu.memory_space<vmem>>) attributes {dimension_semantics = [#tpu.dimension_semantics<parallel>, #tpu.dimension_semantics<arbitrary>], iteration_bounds = array<i64: 1, 1>, scalar_prefetch = 0 : i64, scratch_operands = 2 : i64, tpu.core_type = #tpu.core_type<tc>, window_params = [{transform_indices = @transform_0, window_bounds = array<i64: 128, 1>}, {transform_indices = @transform_1, window_bounds = array<i64: 1, 128>}, {transform_indices = @transform_2, window_bounds = array<i64: 128, 32>}, {transform_indices = @transform_3, window_bounds = array<i64: 128, 32>}, {transform_indices = @transform_4, window_bounds = array<i64: 128, 1>}]} {
    %c0 = arith.constant 0 : index
    %c0_0 = arith.constant 0 : index
    %0 = vector.load %arg2[%c0, %c0_0] : memref<128x1xi32, #tpu.memory_space<vmem>>, vector<128x1xi32>
    %c0_1 = arith.constant 0 : index
    %c0_2 = arith.constant 0 : index
    %1 = vector.load %arg3[%c0_1, %c0_2] : memref<1x128xi32, #tpu.memory_space<vmem>>, vector<1x128xi32>
    %2 = vector.broadcast %0 : vector<128x1xi32> to vector<128x128xi32>
    %3 = vector.broadcast %1 : vector<1x128xi32> to vector<128x128xi32>
    %4 = arith.cmpi eq, %2, %3 : vector<128x128xi32>
    %5 = arith.extui %4 : vector<128x128xi1> to vector<128x128xi32>
    %6 = arith.sitofp %5 : vector<128x128xi32> to vector<128x128xf32>
    %c0_i32 = arith.constant 0 : i32
    %7 = arith.cmpi eq, %arg1, %c0_i32 : i32
    %8 = arith.extui %7 : i1 to i32
    %c0_i32_3 = arith.constant 0 : i32
    %9 = arith.cmpi ne, %8, %c0_i32_3 : i32
    scf.if %9 {
      %c0_14 = arith.constant 0 : index
      %c0_15 = arith.constant 0 : index
      %24 = vector.load %arg4[%c0_14, %c0_15] : memref<128x32xf32, #tpu.memory_space<vmem>>, vector<128x32xf32>
      %cst_16 = arith.constant 14.2857141 : f32
      %25 = vector.broadcast %cst_16 : f32 to vector<128x32xf32>
      %26 = arith.mulf %24, %25 : vector<128x32xf32>
      %c0_17 = arith.constant 0 : index
      %c0_18 = arith.constant 0 : index
      %27 = vector.load %arg7[%c0_17, %c0_18] : memref<128x32xf32, #tpu.memory_space<vmem>>, vector<128x32xf32>
      tpu.vector_store %arg7[%c0_17, %c0_18], %26 {strides = array<i32>} : memref<128x32xf32, #tpu.memory_space<vmem>>, vector<128x32xf32>,
      %cst_19 = arith.constant 0.000000e+00 : f32
      %28 = vector.broadcast %cst_19 : f32 to vector<128x8xf32>
      %c0_20 = arith.constant 0 : index
      %c0_21 = arith.constant 0 : index
      %29 = vector.load %arg8[%c0_20, %c0_21] : memref<128x8xf32, #tpu.memory_space<vmem>>, vector<128x8xf32>
      tpu.vector_store %arg8[%c0_20, %c0_21], %28 {strides = array<i32>} : memref<128x8xf32, #tpu.memory_space<vmem>>, vector<128x8xf32>,
      %cst_22 = arith.constant 0xFF800000 : f32
      %30 = vector.broadcast %cst_22 : f32 to vector<128x1xf32>
      %c0_23 = arith.constant 0 : index
      %c0_24 = arith.constant 0 : index
      %31 = vector.load %arg8[%c0_23, %c0_24] : memref<128x8xf32, #tpu.memory_space<vmem>>, vector<128x1xf32>
      tpu.vector_store %arg8[%c0_23, %c0_24], %30 {strides = array<i32>} : memref<128x8xf32, #tpu.memory_space<vmem>>, vector<128x1xf32>,
    } else {
    }
    %c0_4 = arith.constant 0 : index
    %c0_5 = arith.constant 0 : index
    %10 = vector.load %arg7[%c0_4, %c0_5] : memref<128x32xf32, #tpu.memory_space<vmem>>, vector<128x32xf32>
    %c0_6 = arith.constant 0 : index
    %c0_7 = arith.constant 0 : index
    %11 = vector.load %arg5[%c0_6, %c0_7] : memref<128x32xf32, #tpu.memory_space<vmem>>, vector<128x32xf32>
    %cst = arith.constant dense<0.000000e+00> : vector<128x128xf32>
    %12 = tpu.matmul %10, %11, %cst {dimension_numbers = #tpu.dot_dimension_numbers<[1], [1], [0], [0], [0, 0, 1, 0], [], []>} : vector<128x32xf32>, vector<128x32xf32>, vector<128x128xf32> -> vector<128x128xf32>
    %13 = arith.cmpi eq, %arg0, %arg1 : i32
    %c0_i32_8 = arith.constant 0 : i32
    %14 = arith.cmpi eq, %arg1, %c0_i32_8 : i32
    %15 = arith.ori %13, %14 : i1
    %16 = arith.extui %15 : i1 to i32
    %cst_9 = arith.constant 0xFF800000 : f32
    %c0_i32_10 = arith.constant 0 : i32
    %17 = arith.cmpi ne, %16, %c0_i32_10 : i32
    scf.if %17 {
      %c128_i32 = arith.constant 128 : i32
      %24 = arith.muli %arg0, %c128_i32 : i32
      %25 = tpu.iota {dimensions = array<i32: 0>} : vector<128x128xi32>
      %26 = vector.broadcast %24 : i32 to vector<128x128xi32>
      %27 = arith.addi %26, %25 : vector<128x128xi32>
      %c128_i32_14 = arith.constant 128 : i32
      %28 = arith.muli %arg1, %c128_i32_14 : i32
      %29 = tpu.iota {dimensions = array<i32: 1>} : vector<128x128xi32>
      %30 = vector.broadcast %28 : i32 to vector<128x128xi32>
      %31 = arith.addi %30, %29 : vector<128x128xi32>
      %32 = arith.cmpi ne, %27, %31 : vector<128x128xi32>
      %c16_i32 = arith.constant 16 : i32
      %33 = vector.broadcast %c16_i32 : i32 to vector<128x128xi32>
      %34 = arith.cmpi slt, %31, %33 : vector<128x128xi32>
      %35 = arith.andi %34, %32 : vector<128x128xi1>
      %36 = vector.broadcast %cst_9 : f32 to vector<128x128xf32>
      %37 = arith.select %34, %12, %36 : vector<128x128xi1>, vector<128x128xf32>
      %38 = vector.broadcast %cst_9 : f32 to vector<128x128xf32>
      %39 = arith.select %35, %12, %38 : vector<128x128xi1>, vector<128x128xf32>
      %cst_15 = arith.constant 0.000000e+00 : f32
      %40 = vector.broadcast %cst_15 : f32 to vector<128x128xf32>
      %41 = arith.select %35, %6, %40 : vector<128x128xi1>, vector<128x128xf32>
      %c0_16 = arith.constant 0 : index
      %c0_17 = arith.constant 0 : index
      %42 = vector.load %arg8[%c0_16, %c0_17] : memref<128x8xf32, #tpu.memory_space<vmem>>, vector<128x1xf32>
      %c0_18 = arith.constant 0 : index
      %c1 = arith.constant 1 : index
      %43 = vector.load %arg8[%c0_18, %c1] : memref<128x8xf32, #tpu.memory_space<vmem>>, vector<128x1xf32>
      %c0_19 = arith.constant 0 : index
      %c2 = arith.constant 2 : index
      %44 = vector.load %arg8[%c0_19, %c2] : memref<128x8xf32, #tpu.memory_space<vmem>>, vector<128x1xf32>
      %c0_20 = arith.constant 0 : index
      %c3 = arith.constant 3 : index
      %45 = vector.load %arg8[%c0_20, %c3] : memref<128x8xf32, #tpu.memory_space<vmem>>, vector<128x1xf32>
      %cst_21 = arith.constant dense<0xFF800000> : vector<128xf32>
      %46 = vector.multi_reduction <maximumf>, %37, %cst_21 [1] : vector<128x128xf32> to vector<128xf32>
      %47 = vector.shape_cast %46 : vector<128xf32> to vector<128x1xf32>
      %48 = arith.maximumf %42, %47 : vector<128x1xf32>
      %49 = arith.subf %42, %48 : vector<128x1xf32>
      %50 = math.exp %49 : vector<128x1xf32>
      %51 = vector.broadcast %48 : vector<128x1xf32> to vector<128x128xf32>
      %52 = arith.subf %39, %51 : vector<128x128xf32>
      %53 = math.exp %52 : vector<128x128xf32>
      %cst_22 = arith.constant dense<0.000000e+00> : vector<128xf32>
      %54 = vector.multi_reduction <add>, %53, %cst_22 [1] : vector<128x128xf32> to vector<128xf32>
      %55 = vector.shape_cast %54 : vector<128xf32> to vector<128x1xf32>
      %c0_23 = arith.constant 0 : index
      %c0_24 = arith.constant 0 : index
      %56 = vector.load %arg8[%c0_23, %c0_24] : memref<128x8xf32, #tpu.memory_space<vmem>>, vector<128x1xf32>
      tpu.vector_store %arg8[%c0_23, %c0_24], %48 {strides = array<i32>} : memref<128x8xf32, #tpu.memory_space<vmem>>, vector<128x1xf32>,
      %57 = arith.mulf %50, %43 : vector<128x1xf32>
      %58 = arith.addf %57, %55 : vector<128x1xf32>
      %c0_25 = arith.constant 0 : index
      %c1_26 = arith.constant 1 : index
      %59 = vector.load %arg8[%c0_25, %c1_26] : memref<128x8xf32, #tpu.memory_space<vmem>>, vector<128x1xf32>
      tpu.vector_store %arg8[%c0_25, %c1_26], %58 {strides = array<i32>} : memref<128x8xf32, #tpu.memory_space<vmem>>, vector<128x1xf32>,
      %60 = arith.mulf %41, %12 : vector<128x128xf32>
      %cst_27 = arith.constant dense<0.000000e+00> : vector<128xf32>
      %61 = vector.multi_reduction <add>, %60, %cst_27 [1] : vector<128x128xf32> to vector<128xf32>
      %62 = vector.shape_cast %61 : vector<128xf32> to vector<128x1xf32>
      %63 = arith.addf %44, %62 : vector<128x1xf32>
      %c0_28 = arith.constant 0 : index
      %c2_29 = arith.constant 2 : index
      %64 = vector.load %arg8[%c0_28, %c2_29] : memref<128x8xf32, #tpu.memory_space<vmem>>, vector<128x1xf32>
      tpu.vector_store %arg8[%c0_28, %c2_29], %63 {strides = array<i32>} : memref<128x8xf32, #tpu.memory_space<vmem>>, vector<128x1xf32>,
      %cst_30 = arith.constant dense<0.000000e+00> : vector<128xf32>
      %65 = vector.multi_reduction <add>, %41, %cst_30 [1] : vector<128x128xf32> to vector<128xf32>
      %66 = vector.shape_cast %65 : vector<128xf32> to vector<128x1xf32>
      %67 = arith.addf %45, %66 : vector<128x1xf32>
      %c0_31 = arith.constant 0 : index
      %c3_32 = arith.constant 3 : index
      %68 = vector.load %arg8[%c0_31, %c3_32] : memref<128x8xf32, #tpu.memory_space<vmem>>, vector<128x1xf32>
      tpu.vector_store %arg8[%c0_31, %c3_32], %67 {strides = array<i32>} : memref<128x8xf32, #tpu.memory_space<vmem>>, vector<128x1xf32>,
    } else {
    }
    %true = arith.constant true
    %18 = arith.xori %15, %true : i1
    %19 = arith.extui %18 : i1 to i32
    %c0_i32_11 = arith.constant 0 : i32
    %20 = arith.cmpi ne, %19, %c0_i32_11 : i32
    scf.if %20 {
      %c0_14 = arith.constant 0 : index
      %c0_15 = arith.constant 0 : index
      %24 = vector.load %arg8[%c0_14, %c0_15] : memref<128x8xf32, #tpu.memory_space<vmem>>, vector<128x1xf32>
      %c0_16 = arith.constant 0 : index
      %c1 = arith.constant 1 : index
      %25 = vector.load %arg8[%c0_16, %c1] : memref<128x8xf32, #tpu.memory_space<vmem>>, vector<128x1xf32>
      %c0_17 = arith.constant 0 : index
      %c2 = arith.constant 2 : index
      %26 = vector.load %arg8[%c0_17, %c2] : memref<128x8xf32, #tpu.memory_space<vmem>>, vector<128x1xf32>
      %c0_18 = arith.constant 0 : index
      %c3 = arith.constant 3 : index
      %27 = vector.load %arg8[%c0_18, %c3] : memref<128x8xf32, #tpu.memory_space<vmem>>, vector<128x1xf32>
      %cst_19 = arith.constant dense<0xFF800000> : vector<128xf32>
      %28 = vector.multi_reduction <maximumf>, %12, %cst_19 [1] : vector<128x128xf32> to vector<128xf32>
      %29 = vector.shape_cast %28 : vector<128xf32> to vector<128x1xf32>
      %30 = arith.maximumf %24, %29 : vector<128x1xf32>
      %31 = arith.subf %24, %30 : vector<128x1xf32>
      %32 = math.exp %31 : vector<128x1xf32>
      %33 = vector.broadcast %30 : vector<128x1xf32> to vector<128x128xf32>
      %34 = arith.subf %12, %33 : vector<128x128xf32>
      %35 = math.exp %34 : vector<128x128xf32>
      %cst_20 = arith.constant dense<0.000000e+00> : vector<128xf32>
      %36 = vector.multi_reduction <add>, %35, %cst_20 [1] : vector<128x128xf32> to vector<128xf32>
      %37 = vector.shape_cast %36 : vector<128xf32> to vector<128x1xf32>
      %c0_21 = arith.constant 0 : index
      %c0_22 = arith.constant 0 : index
      %38 = vector.load %arg8[%c0_21, %c0_22] : memref<128x8xf32, #tpu.memory_space<vmem>>, vector<128x1xf32>
      tpu.vector_store %arg8[%c0_21, %c0_22], %30 {strides = array<i32>} : memref<128x8xf32, #tpu.memory_space<vmem>>, vector<128x1xf32>,
      %39 = arith.mulf %32, %25 : vector<128x1xf32>
      %40 = arith.addf %39, %37 : vector<128x1xf32>
      %c0_23 = arith.constant 0 : index
      %c1_24 = arith.constant 1 : index
      %41 = vector.load %arg8[%c0_23, %c1_24] : memref<128x8xf32, #tpu.memory_space<vmem>>, vector<128x1xf32>
      tpu.vector_store %arg8[%c0_23, %c1_24], %40 {strides = array<i32>} : memref<128x8xf32, #tpu.memory_space<vmem>>, vector<128x1xf32>,
      %42 = arith.mulf %6, %12 : vector<128x128xf32>
      %cst_25 = arith.constant dense<0.000000e+00> : vector<128xf32>
      %43 = vector.multi_reduction <add>, %42, %cst_25 [1] : vector<128x128xf32> to vector<128xf32>
      %44 = vector.shape_cast %43 : vector<128xf32> to vector<128x1xf32>
      %45 = arith.addf %26, %44 : vector<128x1xf32>
      %c0_26 = arith.constant 0 : index
      %c2_27 = arith.constant 2 : index
      %46 = vector.load %arg8[%c0_26, %c2_27] : memref<128x8xf32, #tpu.memory_space<vmem>>, vector<128x1xf32>
      tpu.vector_store %arg8[%c0_26, %c2_27], %45 {strides = array<i32>} : memref<128x8xf32, #tpu.memory_space<vmem>>, vector<128x1xf32>,
      %cst_28 = arith.constant dense<0.000000e+00> : vector<128xf32>
      %47 = vector.multi_reduction <add>, %6, %cst_28 [1] : vector<128x128xf32> to vector<128xf32>
      %48 = vector.shape_cast %47 : vector<128xf32> to vector<128x1xf32>
      %49 = arith.addf %27, %48 : vector<128x1xf32>
      %c0_29 = arith.constant 0 : index
      %c3_30 = arith.constant 3 : index
      %50 = vector.load %arg8[%c0_29, %c3_30] : memref<128x8xf32, #tpu.memory_space<vmem>>, vector<128x1xf32>
      tpu.vector_store %arg8[%c0_29, %c3_30], %49 {strides = array<i32>} : memref<128x8xf32, #tpu.memory_space<vmem>>, vector<128x1xf32>,
    } else {
    }
    %c0_i32_12 = arith.constant 0 : i32
    %21 = arith.cmpi eq, %arg1, %c0_i32_12 : i32
    %22 = arith.extui %21 : i1 to i32
    %c0_i32_13 = arith.constant 0 : i32
    %23 = arith.cmpi ne, %22, %c0_i32_13 : i32
    scf.if %23 {
      %c0_14 = arith.constant 0 : index
      %c0_15 = arith.constant 0 : index
      %24 = vector.load %arg8[%c0_14, %c0_15] : memref<128x8xf32, #tpu.memory_space<vmem>>, vector<128x1xf32>
      %c0_16 = arith.constant 0 : index
      %c1 = arith.constant 1 : index
      %25 = vector.load %arg8[%c0_16, %c1] : memref<128x8xf32, #tpu.memory_space<vmem>>, vector<128x1xf32>
      %c0_17 = arith.constant 0 : index
      %c2 = arith.constant 2 : index
      %26 = vector.load %arg8[%c0_17, %c2] : memref<128x8xf32, #tpu.memory_space<vmem>>, vector<128x1xf32>
      %c0_18 = arith.constant 0 : index
      %c3 = arith.constant 3 : index
      %27 = vector.load %arg8[%c0_18, %c3] : memref<128x8xf32, #tpu.memory_space<vmem>>, vector<128x1xf32>
      %28 = math.log %25 : vector<128x1xf32>
      %29 = arith.addf %24, %28 : vector<128x1xf32>
      %c128_i32 = arith.constant 128 : i32
      %30 = arith.muli %arg0, %c128_i32 : i32
      %31 = tpu.iota {dimensions = array<i32: 0>} : vector<128x1xi32>
      %32 = vector.broadcast %30 : i32 to vector<128x1xi32>
      %33 = arith.addi %32, %31 : vector<128x1xi32>
      %c16_i32 = arith.constant 16 : i32
      %34 = vector.broadcast %c16_i32 : i32 to vector<128x1xi32>
      %35 = arith.cmpi slt, %33, %34 : vector<128x1xi32>
      %cst_19 = arith.constant 0.000000e+00 : f32
      %36 = vector.broadcast %cst_19 : f32 to vector<128x1xf32>
      %37 = arith.cmpf ogt, %27, %36 : vector<128x1xf32>
      %38 = arith.andi %35, %37 : vector<128x1xi1>
      %39 = arith.mulf %27, %29 : vector<128x1xf32>
      %40 = arith.subf %26, %39 : vector<128x1xf32>
      %41 = arith.divf %40, %27 : vector<128x1xf32>
      %cst_20 = arith.constant 0.000000e+00 : f32
      %42 = vector.broadcast %cst_20 : f32 to vector<128x1xf32>
      %43 = arith.select %38, %41, %42 : vector<128x1xi1>, vector<128x1xf32>
      %cst_21 = arith.constant -1.000000e+00 : f32
      %44 = vector.broadcast %cst_21 : f32 to vector<128x1xf32>
      %45 = arith.mulf %44, %43 : vector<128x1xf32>
      %c0_22 = arith.constant 0 : index
      %c0_23 = arith.constant 0 : index
      %46 = vector.load %arg6[%c0_22, %c0_23] : memref<128x1xf32, #tpu.memory_space<vmem>>, vector<128x1xf32>
      tpu.vector_store %arg6[%c0_22, %c0_23], %45 {strides = array<i32>} : memref<128x1xf32, #tpu.memory_space<vmem>>, vector<128x1xf32>,
    } else {
    }
    return
  }
  func.func @transform_0(%arg0: i32, %arg1: i32) -> (i32, i32) {
    %c0_i32 = arith.constant 0 : i32
    %c0_i32_0 = arith.constant 0 : i32
    return %arg0, %c0_i32 : i32, i32
  }
  func.func @transform_1(%arg0: i32, %arg1: i32) -> (i32, i32) {
    %c0_i32 = arith.constant 0 : i32
    %c0_i32_0 = arith.constant 0 : i32
    return %c0_i32, %arg1 : i32, i32
  }
  func.func @transform_2(%arg0: i32, %arg1: i32) -> (i32, i32) {
    %c0_i32 = arith.constant 0 : i32
    %c0_i32_0 = arith.constant 0 : i32
    return %arg0, %c0_i32 : i32, i32
  }
  func.func @transform_3(%arg0: i32, %arg1: i32) -> (i32, i32) {
    %c0_i32 = arith.constant 0 : i32
    %c0_i32_0 = arith.constant 0 : i32
    return %arg1, %c0_i32 : i32, i32
  }
  func.func @transform_4(%arg0: i32, %arg1: i32) -> (i32, i32) {
    %c0_i32 = arith.constant 0 : i32
    %c0_i32_0 = arith.constant 0 : i32
    return %arg0, %c0_i32 : i32, i32
  }
}

</mosaic_0001>

<bundles_post_ra>
// kernel: tpu_custom_call.1
= control target key start
LH: loop header
LB: loop body
LE: loop exit
PB: predicated region body
PF: predicated region fallthrough
CT: control target
= control target key end

     0   :  { %vm170_vm0 = vcmask 261120   ;;  %vm187_vm1 = vcmask 64512   ;;  %v2817_v3 = vmov 0   ;;  %v4127_v4 = vmov 0.0   ;;  %s2820_s18 = smov 127   ;;  %s2822_s7 = smov 3   ;;  %s4122_s3 = inlined_call_operand.vmem [shape: f32[128,32], index: 3, kind: input, shape index: {}]   ;;  %s4123_s2 = inlined_call_operand.vmem [shape: f32[128,32], index: 2, kind: input, shape index: {}]   ;;  %s4124_s0 = inlined_call_operand.vmem [shape: s32[128,1], index: 0, kind: input, shape index: {}]   ;;  %s4125_s1 = inlined_call_operand.vmem [shape: s32[1,128], index: 1, kind: input, shape index: {}]   ;;  %s4126_s4 = inlined_call_operand.vmem [shape: f32[128,1], index: 4, kind: output, shape index: {}]  }
   0x1   :  { %v237_v0 = vld [vmem:[%s4122_s3] sm:$0xff]  ;;  %v238_v1 = vld [vmem:[%s4122_s3 + $0x8] sm:$0xff]  ;;  %vm2858_vm2 = vmpackc.low %vm170_vm0, %vm170_vm0  ;;  %2708 = vset.pattern.permute.xlu0 %v2817_v3  ;;  %188 = vst.msk [vmem:[#allocation3] sm:$0xff] %vm187_vm1, %v4127_v4  ;;  %vm204_vm3 = vcmask 7168   ;;  %2709 = vset.pattern.permute.xlu1 %v2817_v3  ;;  %v2819_v8 = vmov -inf  }
   0x2   :  { %189 = vst.msk [vmem:[#allocation3 + $0x8] sm:$0xff] %vm187_vm1, %v4127_v4  ;;  %190 = vst.msk [vmem:[#allocation3 + $0x10] sm:$0xff] %vm187_vm1, %v4127_v4  ;;  %v2636_v5 = vpack.c.bf16 %v238_v1, %v237_v0  ;;  %v239_v6 = vld [vmem:[%s4122_s3 + $0x10] sm:$0xff]  ;;  %v240_v7 = vld [vmem:[%s4122_s3 + $0x18] sm:$0xff] }
   0x3   :  { %191 = vst.msk [vmem:[#allocation3 + $0x18] sm:$0xff] %vm187_vm1, %v4127_v4  ;;  %192 = vst.msk [vmem:[#allocation3 + $0x20] sm:$0xff] %vm187_vm1, %v4127_v4  ;;  %v2642_v9 = vpack.c.bf16 %v240_v7, %v239_v6  ;;  %v241_v10 = vld [vmem:[%s4122_s3 + $0x20] sm:$0xff]  ;;  %v242_v11 = vld [vmem:[%s4122_s3 + $0x28] sm:$0xff] }
   0x4   :  { %193 = vst.msk [vmem:[#allocation3 + $0x28] sm:$0xff] %vm187_vm1, %v4127_v4  ;;  %194 = vst.msk [vmem:[#allocation3 + $0x30] sm:$0xff] %vm187_vm1, %v4127_v4  ;;  %2638 = vmatprep.subr.msk.bf16.mxu0 %vm2858_vm2, %v2636_v5  ;;  %2684 = vmatprep.subr.msk.bf16.mxu1 %vm2858_vm2, %v2636_v5  ;;  %v138_v12 = vld [vmem:[%s4123_s2] sm:$0xff]  ;;  %v139_v14 = vld [vmem:[%s4123_s2 + $0x8] sm:$0xff]  ;;  %v2648_v23 = vpack.c.bf16 %v242_v11, %v241_v10 }
   0x5   :  { %195 = vst.msk [vmem:[#allocation3 + $0x38] sm:$0xff] %vm187_vm1, %v4127_v4  ;;  %196 = vst.msk [vmem:[#allocation3 + $0x40] sm:$0xff] %vm187_vm1, %v4127_v4  ;;  %2641 = vmatpush3.bf16.xpose.msk.msra.mxu0 %vm2858_vm2, %v2636_v5  ;;  %2692 = vmatpush3.bf16.xpose.msk.msra.mxu1 %vm2858_vm2, %v2636_v5  ;;  %v154_v13 = vmul.f32 14.285714, %v138_v12  ;;  %v146_v15 = vld [vmem:[%s4123_s2 + $0x40] sm:$0xff]  ;;  %v140_v16 = vld [vmem:[%s4123_s2 + $0x10] sm:$0xff] }
   0x6   :  { %197 = vst.msk [vmem:[#allocation3 + $0x48] sm:$0xff] %vm187_vm1, %v4127_v4  ;;  %198 = vst.msk [vmem:[#allocation3 + $0x50] sm:$0xff] %vm187_vm1, %v4127_v4  ;;  %2644 = vmatprep.subr.msk.bf16.mxu0 %vm2858_vm2, %v2642_v9  ;;  %2685 = vmatprep.subr.msk.bf16.mxu1 %vm2858_vm2, %v2642_v9  ;;  %v155_v17 = vmul.f32 14.285714, %v139_v14  ;;  %v162_v18 = vmul.f32 14.285714, %v146_v15 }
   0x7   :  { %199 = vst.msk [vmem:[#allocation3 + $0x58] sm:$0xff] %vm187_vm1, %v4127_v4  ;;  %200 = vst.msk [vmem:[#allocation3 + $0x60] sm:$0xff] %vm187_vm1, %v4127_v4  ;;  %v156_v19 = vmul.f32 14.285714, %v140_v16  ;;  %v147_v20 = vld [vmem:[%s4123_s2 + $0x48] sm:$0xff]  ;;  %v141_v21 = vld [vmem:[%s4123_s2 + $0x18] sm:$0xff] }
   0x8   :  { %201 = vst.msk [vmem:[#allocation3 + $0x68] sm:$0xff] %vm187_vm1, %v4127_v4  ;;  %202 = vst.msk [vmem:[#allocation3 + $0x70] sm:$0xff] %vm187_vm1, %v4127_v4  ;;  %v142_v22 = vld [vmem:[%s4123_s2 + $0x20] sm:$0xff]  ;;  %v163_v24 = vmul.f32 14.285714, %v147_v20  ;;  %v143_v27 = vld [vmem:[%s4123_s2 + $0x28] sm:$0xff] }
   0x9   :  { %203 = vst.msk [vmem:[#allocation3 + $0x78] sm:$0xff] %vm187_vm1, %v4127_v4  ;;  %v157_v25 = vmul.f32 14.285714, %v141_v21  ;;  %v158_v26 = vmul.f32 14.285714, %v142_v22  ;;  %v148_v28 = vld [vmem:[%s4123_s2 + $0x50] sm:$0xff] }
   0xa   :  { %205 = vst.msk [vmem:[#allocation3] sm:$0xff] %vm204_vm3, %v2819_v8  ;;  %206 = vst.msk [vmem:[#allocation3 + $0x8] sm:$0xff] %vm204_vm3, %v2819_v8  ;;  %v149_v29 = vld [vmem:[%s4123_s2 + $0x58] sm:$0xff]  ;;  %v159_v30 = vmul.f32 14.285714, %v143_v27  ;;  %v243_v33 = vld [vmem:[%s4122_s3 + $0x30] sm:$0xff] }
   0xb   :  { %207 = vst.msk [vmem:[#allocation3 + $0x10] sm:$0xff] %vm204_vm3, %v2819_v8  ;;  %208 = vst.msk [vmem:[#allocation3 + $0x18] sm:$0xff] %vm204_vm3, %v2819_v8  ;;  %v164_v31 = vmul.f32 14.285714, %v148_v28  ;;  %v165_v32 = vmul.f32 14.285714, %v149_v29 }
   0xc   :  { %209 = vst.msk [vmem:[#allocation3 + $0x20] sm:$0xff] %vm204_vm3, %v2819_v8  ;;  %210 = vst.msk [vmem:[#allocation3 + $0x28] sm:$0xff] %vm204_vm3, %v2819_v8  ;;  %v244_v34 = vld [vmem:[%s4122_s3 + $0x38] sm:$0xff]  ;;  %v150_v35 = vld [vmem:[%s4123_s2 + $0x60] sm:$0xff] }
   0xd   :  { %211 = vst.msk [vmem:[#allocation3 + $0x30] sm:$0xff] %vm204_vm3, %v2819_v8  ;;  %212 = vst.msk [vmem:[#allocation3 + $0x38] sm:$0xff] %vm204_vm3, %v2819_v8  ;;  %2647 = vmatpush3.bf16.xpose.msk.msra.mxu0 %vm2858_vm2, %v2642_v9  ;;  %2693 = vmatpush3.bf16.xpose.msk.msra.mxu1 %vm2858_vm2, %v2642_v9  ;;  %v151_v36 = vld [vmem:[%s4123_s2 + $0x68] sm:$0xff]  ;;  %v144_v37 = vld [vmem:[%s4123_s2 + $0x30] sm:$0xff]  ;;  %v166_v38 = vmul.f32 14.285714, %v150_v35  ;;  %v2654_v50 = vpack.c.bf16 %v244_v34, %v243_v33  ;;  %v501_v34 = vlaneseq }
   0xe   :  { %213 = vst.msk [vmem:[#allocation3 + $0x40] sm:$0xff] %vm204_vm3, %v2819_v8  ;;  %214 = vst.msk [vmem:[#allocation3 + $0x48] sm:$0xff] %vm204_vm3, %v2819_v8  ;;  %2650 = vmatprep.subr.msk.bf16.mxu0 %vm2858_vm2, %v2648_v23  ;;  %2686 = vmatprep.subr.msk.bf16.mxu1 %vm2858_vm2, %v2648_v23  ;;  %v167_v39 = vmul.f32 14.285714, %v151_v36  ;;  %v160_v40 = vmul.f32 14.285714, %v144_v37 }
   0xf   :  { %215 = vst.msk [vmem:[#allocation3 + $0x50] sm:$0xff] %vm204_vm3, %v2819_v8  ;;  %216 = vst.msk [vmem:[#allocation3 + $0x58] sm:$0xff] %vm204_vm3, %v2819_v8  ;;  %v145_v41 = vld [vmem:[%s4123_s2 + $0x38] sm:$0xff]  ;;  %v152_v42 = vld [vmem:[%s4123_s2 + $0x70] sm:$0xff]  ;;  %v3174_v35 = vshrl.u32 %v501_v34, 7  ;;  %v3176_v36 = vand.u32 127, %v501_v34 }
  0x10   :  { %217 = vst.msk [vmem:[#allocation3 + $0x60] sm:$0xff] %vm204_vm3, %v2819_v8  ;;  %218 = vst.msk [vmem:[#allocation3 + $0x68] sm:$0xff] %vm204_vm3, %v2819_v8  ;;  %v153_v43 = vld [vmem:[%s4123_s2 + $0x78] sm:$0xff]  ;;  %v161_v45 = vmul.f32 14.285714, %v145_v41  ;;  %v17_v47 = vld [vmem:[%s4124_s0] sm:$0xff] }
  0x11   :  { %219 = vst.msk [vmem:[#allocation3 + $0x70] sm:$0xff] %vm204_vm3, %v2819_v8  ;;  %220 = vst.msk [vmem:[#allocation3 + $0x78] sm:$0xff] %vm204_vm3, %v2819_v8  ;;  %v168_v46 = vmul.f32 14.285714, %v152_v42  ;;  %v169_v49 = vmul.f32 14.285714, %v153_v43  ;;  %35 = vperm.xlu0 %2708, %v17_v47   ;;  %vm540_vm4 = vcmp.ne.s32.totalorder %v3174_v35, %v3176_v36 }
  0x12   :  { %171 = vst.msk [vmem:[#allocation2] sm:$0xff] %vm170_vm0, %v154_v13  ;;  %172 = vst.msk [vmem:[#allocation2 + $0x8] sm:$0xff] %vm170_vm0, %v155_v17  ;;  %v18_v51 = vld [vmem:[%s4124_s0 + $0x8] sm:$0xff]  ;;  %v3020_v52 = vld [vmem:[#allocation3] sm:$0xff]  ;;  %v503_v37 = vadd.s32 8, %v3174_v35  ;;  %vm556_vm5 = vcmp.lt.s32.totalorder %v3176_v36, 16 }
  0x13   :  { %179 = vst.msk [vmem:[#allocation2 + $0x40] sm:$0xff] %vm170_vm0, %v162_v18  ;;  %173 = vst.msk [vmem:[#allocation2 + $0x10] sm:$0xff] %vm170_vm0, %v156_v19  ;;  %38 = vperm.xlu1 %2709, %v18_v51   ;;  %v3022_v53 = vld [vmem:[#allocation3 + $0x8] sm:$0xff]  ;;  %v245_v54 = vld [vmem:[%s4122_s3 + $0x40] sm:$0xff] }
  0x14   :  { %180 = vst.msk [vmem:[#allocation2 + $0x48] sm:$0xff] %vm170_vm0, %v163_v24  ;;  %174 = vst.msk [vmem:[#allocation2 + $0x18] sm:$0xff] %vm170_vm0, %v157_v25  ;;  %v246_v55 = vld [vmem:[%s4122_s3 + $0x48] sm:$0xff]  ;;  %v19_v56 = vld [vmem:[%s4124_s0 + $0x10] sm:$0xff]  ;;  %vm541_vm6 = vcmp.ne.s32.totalorder %v503_v37, %v3176_v36 }
  0x15   :  { %175 = vst.msk [vmem:[#allocation2 + $0x20] sm:$0xff] %vm170_vm0, %v158_v26  ;;  %176 = vst.msk [vmem:[#allocation2 + $0x28] sm:$0xff] %vm170_vm0, %v159_v30  ;;  %2653 = vmatpush3.bf16.xpose.msk.msra.mxu0 %vm2858_vm2, %v2648_v23  ;;  %2694 = vmatpush3.bf16.xpose.msk.msra.mxu1 %vm2858_vm2, %v2648_v23  ;;  %v21_v57 = vld [vmem:[%s4124_s0 + $0x20] sm:$0xff]  ;;  %v2660_v58 = vpack.c.bf16 %v246_v55, %v245_v54  ;;  %v20_v59 = vld [vmem:[%s4124_s0 + $0x18] sm:$0xff] }
  0x16   :  { %181 = vst.msk [vmem:[#allocation2 + $0x50] sm:$0xff] %vm170_vm0, %v164_v31  ;;  %182 = vst.msk [vmem:[#allocation2 + $0x58] sm:$0xff] %vm170_vm0, %v165_v32  ;;  %2656 = vmatprep.subr.msk.bf16.mxu0 %vm2858_vm2, %v2654_v50  ;;  %2687 = vmatprep.subr.msk.bf16.mxu1 %vm2858_vm2, %v2654_v50  ;;  %v3051_v60 = vld [vmem:[#allocation3 + $0x18] sm:$0xff]  ;;  %v247_v61 = vld [vmem:[%s4122_s3 + $0x50] sm:$0xff] }
  0x17   :  { %183 = vst.msk [vmem:[#allocation2 + $0x60] sm:$0xff] %vm170_vm0, %v166_v38  ;;  %184 = vst.msk [vmem:[#allocation2 + $0x68] sm:$0xff] %vm170_vm0, %v167_v39  ;;  %926 = vrot.lane.b32.xlu0 %v3020_v52, %s2820_s18  ;;  %928 = vrot.lane.b32.xlu1 %v3022_v53, %s2820_s18  ;;  %v248_v62 = vld [vmem:[%s4122_s3 + $0x58] sm:$0xff]  ;;  %v22_v63 = vld [vmem:[%s4124_s0 + $0x28] sm:$0xff] }
  0x18   :  { %177 = vst.msk [vmem:[#allocation2 + $0x30] sm:$0xff] %vm170_vm0, %v160_v40  ;;  %178 = vst.msk [vmem:[#allocation2 + $0x38] sm:$0xff] %vm170_vm0, %v161_v45  ;;  %v3072_v0 = vld [vmem:[#allocation3 + $0x20] sm:$0xff]  ;;  %v2666_v1 = vpack.c.bf16 %v248_v62, %v247_v61  ;;  %v3076_v3 = vld [vmem:[#allocation3 + $0x10] sm:$0xff] }
  0x19   :  { %v221_v44 = vld [vmem:[#allocation2] sm:$0xff]  ;;  %185 = vst.msk [vmem:[#allocation2 + $0x70] sm:$0xff] %vm170_vm0, %v168_v46  ;;  %186 = vst.msk [vmem:[#allocation2 + $0x78] sm:$0xff] %vm170_vm0, %v169_v49  ;;  %v3078_v5 = vld [vmem:[#allocation3 + $0x30] sm:$0xff] }
  0x1a   :  { %2612 = vmatprep.mubr.msk.f32.mxu0 %vm170_vm0, %v221_v44  ;;  %v229_v48 = vld [vmem:[#allocation2 + $0x40] sm:$0xff]  ;;  %4166 = vst [vmem:[#allocation4_spill] sm:$0xff] %v3051_v60  ;;  %v250_v7 = vld [vmem:[%s4122_s3 + $0x68] sm:$0xff]  ;;  %v3106_v11 = vld [vmem:[#allocation3 + $0x38] sm:$0xff] }
  0x1b   :  { %2624 = vmatprep.mubr.msk.f32.mxu1 %vm170_vm0, %v229_v48  ;;  %41 = vperm.xlu0 %2708, %v19_v56   ;;  %v249_v6 = vld [vmem:[%s4122_s3 + $0x60] sm:$0xff]  ;;  %v3098_v8 = vld [vmem:[#allocation3 + $0x28] sm:$0xff]  ;;  %4169 = vst [vmem:[#allocation7_spill] sm:$0xff] %v3106_v11  ;;  %v3108_v12 = vld [vmem:[#allocation3 + $0x50] sm:$0xff] }
  0x1c   :  { %47 = vperm.xlu1 %2709, %v21_v57   ;;  %4167 = vst [vmem:[#allocation5_spill] sm:$0xff] %v3098_v8  ;;  %v3100_v9 = vld [vmem:[#allocation3 + $0x40] sm:$0xff]  ;;  %v2672_v10 = vpack.c.bf16 %v250_v7, %v249_v6  ;;  %v251_v13 = vld [vmem:[%s4122_s3 + $0x70] sm:$0xff]  ;;  %v252_v14 = vld [vmem:[%s4122_s3 + $0x78] sm:$0xff] }
  0x1d   :  { %2659 = vmatpush3.bf16.xpose.msk.msra.mxu0 %vm2858_vm2, %v2654_v50  ;;  %2695 = vmatpush3.bf16.xpose.msk.msra.mxu1 %vm2858_vm2, %v2654_v50  ;;  %4168 = vst [vmem:[#allocation6_spill] sm:$0xff] %v3100_v9  ;;  %v3128_v15 = vld [vmem:[#allocation3 + $0x48] sm:$0xff]  ;;  %v3130_v16 = vld [vmem:[#allocation3 + $0x60] sm:$0xff]  ;;  %v2678_v17 = vpack.c.bf16 %v252_v14, %v251_v13  ;;  %v3136_v18 = vld [vmem:[#allocation3 + $0x58] sm:$0xff] }
  0x1e   :  { %2662 = vmatprep.subr.msk.bf16.mxu0 %vm2858_vm2, %v2660_v58  ;;  %2688 = vmatprep.subr.msk.bf16.mxu1 %vm2858_vm2, %v2660_v58  ;;  %4170 = vst [vmem:[#allocation8_spill] sm:$0xff] %v3128_v15  ;;  %4171 = vst [vmem:[#allocation9_spill] sm:$0xff] %v3130_v16  ;;  %v3138_v19 = vld [vmem:[#allocation3 + $0x70] sm:$0xff]  ;;  %v3152_v20 = vld [vmem:[#allocation3 + $0x68] sm:$0xff] }
  0x1f   :  { %44 = vperm.xlu0 %2708, %v20_v59   ;;  %4172 = vst [vmem:[#allocation10_spill] sm:$0xff] %v3136_v18  ;;  %4173 = vst [vmem:[#allocation11_spill] sm:$0xff] %v3138_v19  ;;  %v222_v21 = vld [vmem:[#allocation2 + $0x8] sm:$0xff]  ;;  %v223_v23 = vld [vmem:[#allocation2 + $0x10] sm:$0xff] }
  0x20   :  { %932 = vrot.lane.b32.xlu1 %v3051_v60, %s2820_s18  ;;  %4174 = vst [vmem:[#allocation12_spill] sm:$0xff] %v3152_v20  ;;  %v230_v22 = vld [vmem:[#allocation2 + $0x48] sm:$0xff]  ;;  %v231_v24 = vld [vmem:[#allocation2 + $0x50] sm:$0xff]  ;;  %v224_v25 = vld [vmem:[#allocation2 + $0x18] sm:$0xff] }
  0x21   :  { %v232_v26 = vld [vmem:[#allocation2 + $0x58] sm:$0xff]  ;;  %v225_v27 = vld [vmem:[#allocation2 + $0x20] sm:$0xff]  ;;  %v226_v2 = vld [vmem:[#allocation2 + $0x28] sm:$0xff] }
  0x22   :  { %v233_v28 = vld [vmem:[#allocation2 + $0x60] sm:$0xff]  ;;  %v234_v29 = vld [vmem:[#allocation2 + $0x68] sm:$0xff]  ;;  %v227_v30 = vld [vmem:[#allocation2 + $0x30] sm:$0xff] }
  0x23   :  { %50 = vperm.xlu0 %2708, %v22_v63   ;;  %v235_v31 = vld [vmem:[#allocation2 + $0x70] sm:$0xff]  ;;  %v228_v32 = vld [vmem:[#allocation2 + $0x38] sm:$0xff]  ;;  %v3185_v38 = vld [vmem:[%s4125_s1] ss:$0 sm:$0xff] }
  0x24   :  { %934 = vrot.lane.b32.xlu1 %v3072_v0, %s2820_s18  ;;  %v236_v33 = vld [vmem:[#allocation2 + $0x78] sm:$0xff]  ;;  %vm3190_vm7 = vmand %vm556_vm5, %vm540_vm4 }
  0x25   :  { %2665 = vmatpush3.bf16.xpose.msk.msra.mxu0 %vm2858_vm2, %v2660_v58  ;;  %2696 = vmatpush3.bf16.xpose.msk.msra.mxu1 %vm2858_vm2, %v2660_v58  ;;  %vm3198_vm9 = vmand %vm556_vm5, %vm541_vm6 }
  0x26   :  { %2668 = vmatprep.subr.msk.bf16.mxu0 %vm2858_vm2, %v2666_v1  ;;  %2689 = vmatprep.subr.msk.bf16.mxu1 %vm2858_vm2, %v2666_v1 }
  0x27   :  { %930 = vrot.lane.b32.xlu0 %v3076_v3, %s2820_s18 }
  0x28   :  { %938 = vrot.lane.b32.xlu1 %v3078_v5, %s2820_s18 }
  0x2b   :  { %936 = vrot.lane.b32.xlu0 %v3098_v8, %s2820_s18 }
  0x2c   :  { %942 = vrot.lane.b32.xlu1 %v3100_v9, %s2820_s18 }
  0x2d   :  { %2671 = vmatpush3.bf16.xpose.msk.msra.mxu0 %vm2858_vm2, %v2666_v1  ;;  %2697 = vmatpush3.bf16.xpose.msk.msra.mxu1 %vm2858_vm2, %v2666_v1  ;;  %v504_v1 = vadd.s32 16, %v3174_v35 }
  0x2e   :  { %2674 = vmatprep.subr.msk.bf16.mxu0 %vm2858_vm2, %v2672_v10  ;;  %2690 = vmatprep.subr.msk.bf16.mxu1 %vm2858_vm2, %v2672_v10 }
  0x2f   :  { %940 = vrot.lane.b32.xlu0 %v3106_v11, %s2820_s18  ;;  %vm542_vm12 = vcmp.ne.s32.totalorder %v504_v1, %v3176_v36 }
  0x30   :  { %946 = vrot.lane.b32.xlu1 %v3108_v12, %s2820_s18  ;;  %vm3266_vm13 = vmand %vm556_vm5, %vm542_vm12 }
  0x33   :  { %944 = vrot.lane.b32.xlu0 %v3128_v15, %s2820_s18 }
  0x34   :  { %950 = vrot.lane.b32.xlu1 %v3130_v16, %s2820_s18 }
  0x35   :  { %2677 = vmatpush3.bf16.xpose.msk.msra.mxu0 %vm2858_vm2, %v2672_v10  ;;  %2698 = vmatpush3.bf16.xpose.msk.msra.mxu1 %vm2858_vm2, %v2672_v10 }
  0x36   :  { %2680 = vmatprep.subr.msk.bf16.mxu0 %vm2858_vm2, %v2678_v17  ;;  %2691 = vmatprep.subr.msk.bf16.mxu1 %vm2858_vm2, %v2678_v17 }
  0x37   :  { %948 = vrot.lane.b32.xlu0 %v3136_v18, %s2820_s18 }
  0x38   :  { %954 = vrot.lane.b32.xlu1 %v3138_v19, %s2820_s18 }
  0x3b   :  { %952 = vrot.lane.b32.xlu0 %v3152_v20, %s2820_s18 }
  0x3d   :  { %2683 = vmatpush3.bf16.xpose.msk.msra.mxu0 %vm2858_vm2, %v2678_v17  ;;  %2699 = vmatpush3.bf16.xpose.msk.msra.mxu1 %vm2858_vm2, %v2678_v17 }
  0x44   :  { %2613 = vmatmul.mubr.msk.f32.vlgmr.msra.gmra.mrb[0].mxu0 %vm170_vm0, %v222_v21  ;;  %2625 = vmatmul.mubr.msk.f32.vlgmr.msra.gmra.mrb[0].mxu1 %vm170_vm0, %v230_v22 }
  0x45   :  { %2615 = vmatprep.mubr.msk.f32.mxu0 %vm170_vm0, %v223_v23  ;;  %2627 = vmatprep.mubr.msk.f32.mxu1 %vm170_vm0, %v231_v24 }
  0x48   :  { %2616 = vmatmul.mubr.msk.f32.gmra.mrb[2].mxu0 %vm170_vm0, %v224_v25  ;;  %2628 = vmatmul.mubr.msk.f32.gmra.mrb[2].mxu1 %vm170_vm0, %v232_v26 }
  0x49   :  { %2618 = vmatprep.mubr.msk.f32.mxu0 %vm170_vm0, %v225_v27  ;;  %2630 = vmatprep.mubr.msk.f32.mxu1 %vm170_vm0, %v233_v28 }
  0x4c   :  { %2619 = vmatmul.mubr.msk.f32.gmra.mrb[4].mxu0 %vm170_vm0, %v226_v2  ;;  %2631 = vmatmul.mubr.msk.f32.gmra.mrb[4].mxu1 %vm170_vm0, %v234_v29  ;;  %v507_v2 = vadd.s32 40, %v3174_v35 }
  0x4d   :  { %2621 = vmatprep.mubr.msk.f32.mxu0 %vm170_vm0, %v227_v30  ;;  %2633 = vmatprep.mubr.msk.f32.mxu1 %vm170_vm0, %v235_v31 }
  0x4e   :  { %vm545_vm15 = vcmp.ne.s32.totalorder %v507_v2, %v3176_v36 }
  0x50   :  { %2622 = vmatmul.mubr.msk.f32.gmra.mrb[6].mxu0 %vm170_vm0, %v228_v32  ;;  %2634 = vmatmul.mubr.msk.f32.gmra.mrb[6].mxu1 %vm170_vm0, %v236_v33  ;;  %vm3289_vm0 = vmand %vm556_vm5, %vm545_vm15 }
  0x90   :  { %v36_v39 = vpop.permute.xlu0 %35 }
  0x91   :  { %vm86_vm8 = vcmp.eq.s32.totalorder %v36_v39, %v3185_v38 }
  0x92   :  { %v39_v41 = vpop.permute.xlu1 %38  ;;  %v2500_v42 = vsel %vm86_vm8, 1.0, %v4127_v4 }
  0x93   :  { %vm87_vm10 = vcmp.eq.s32.totalorder %v39_v41, %v3185_v38  ;;  %v3205_v44 = vsel %vm3190_vm7, %v2500_v42, 0.0  ;;  %v3302_v42 = vld [vmem:[#allocation3 + $0x78] sm:$0xff] }
  0x94   :  { %1168 = vadd.xlane.f32.xlu0 %v3205_v44  ;;  %v2501_v45 = vsel %vm87_vm10, 1.0, %v4127_v4  ;;  %v3211_v47 = vpop.permute.xlu0 %926  ;;  %4184 = vst [vmem:[#allocation14_spill] sm:$0xff] %v3302_v42 }
  0x95   :  { %v606_v46 = vsel %vm3198_vm9, %v2501_v45, 0.0 }
  0x96   :  { %v3331_v1 = vpop.permute.xlu1 %928 }
  0x98   :  { %1170 = vadd.xlane.f32.xlu0 %v606_v46 }
  0x9a   :  { %v42_v48 = vpop.permute.xlu0 %41 }
  0x9b   :  { %vm88_vm11 = vcmp.eq.s32.totalorder %v42_v48, %v3185_v38  ;;  %v505_v48 = vadd.s32 24, %v3174_v35 }
  0x9c   :  { %v2502_v25 = vsel %vm88_vm11, 1.0, %v4127_v4 }
  0x9d   :  { %v3277_v30 = vsel %vm3266_vm13, %v2502_v25, 0.0  ;;  %vm543_vm2 = vcmp.ne.s32.totalorder %v505_v48, %v3176_v36 }
  0x9e   :  { %v45_v6 = vpop.permute.xlu0 %44  ;;  %4181 = vst [vmem:[#allocation13_spill] sm:$0xff] %v3277_v30  ;;  %vm3323_vm4 = vmand %vm556_vm5, %vm543_vm2 }
  0x9f   :  { %vm89_vm1 = vcmp.eq.s32.totalorder %v45_v6, %v3185_v38 }
  0xa2   :  { %v51_v29 = vpop.permute.xlu0 %50 }
  0xa3   :  { %vm91_vm14 = vcmp.eq.s32.totalorder %v51_v29, %v3185_v38 }
  0xa4   :  { %v2505_v33 = vsel %vm91_vm14, 1.0, %v4127_v4 }
  0xa5   :  { %v3295_v37 = vsel %vm3289_vm0, %v2505_v33, 0.0 }
 0x117   :  { %v3213_v49 = vpop.f32.mrb[0].mxu0  ;;  %v3215_v50 = vpop.f32.mrb[0].mxu1 }
 0x118   :  { %v3217_v51 = vpop.f32.mrb[1].mxu0  ;;  %v574_v54 = vsel %vm556_vm5, %v3213_v49, -inf  ;;  %v1088_v55 = vmul.f32 %v3213_v49, %v606_v46  ;;  %v3223_v56 = vpop.f32.mrb[1].mxu1  ;;  %v582_v57 = vsel %vm556_vm5, %v3215_v50, -inf }
 0x119   :  { %639 = vmax.xlane.f32.xlu0 %v574_v54  ;;  %v581_v59 = vsel %vm556_vm5, %v3223_v56, -inf  ;;  %v573_v17 = vsel %vm556_vm5, %v3217_v51, -inf  ;;  %v1087_v46 = vmul.f32 %v3205_v44, %v3217_v51 }
 0x11a   :  { %1105 = vadd.xlane.f32.xlu1 %v1088_v55 }
 0x11b   :  { %v3228_v58 = vpop.f32.mrb[2].mxu0  ;;  %v3233_v61 = vpop.f32.mrb[2].mxu1 }
 0x11c   :  { %v3235_v62 = vpop.f32.mrb[3].mxu0  ;;  %v3237_v63 = vpop.f32.mrb[3].mxu1  ;;  %v576_v10 = vsel %vm556_vm5, %v3228_v58, -inf  ;;  %v584_v54 = vsel %vm556_vm5, %v3233_v61, -inf  ;;  %v592_v40 = vsel %vm3323_vm4, %v3228_v58, -inf }
 0x11d   :  { %655 = vmax.xlane.f32.xlu0 %v582_v57  ;;  %v583_v22 = vsel %vm556_vm5, %v3237_v63, -inf  ;;  %v1089_v31 = vmul.f32 %v3277_v30, %v3235_v62  ;;  %v575_v55 = vsel %vm556_vm5, %v3235_v62, -inf  ;;  %v2503_v57 = vsel %vm89_vm1, 1.0, %v4127_v4 }
 0x11e   :  { %653 = vmax.xlane.f32.xlu1 %v581_v59  ;;  %v3329_v59 = vsel %vm3323_vm4, %v2503_v57, 0.0 }
 0x11f   :  { %v3240_v7 = vpop.f32.mrb[4].mxu0  ;;  %v3245_v13 = vpop.f32.mrb[4].mxu1  ;;  %v1090_v6 = vmul.f32 %v3228_v58, %v3329_v59 }
 0x120   :  { %v3247_v14 = vpop.f32.mrb[5].mxu0  ;;  %v3252_v21 = vpop.f32.mrb[5].mxu1  ;;  %v1092_v39 = vmul.f32 %v3240_v7, %v3295_v37  ;;  %v586_v25 = vsel %vm556_vm5, %v3245_v13, -inf }
 0x121   :  { %637 = vmax.xlane.f32.xlu0 %v573_v17  ;;  %v585_v32 = vsel %vm556_vm5, %v3252_v21, -inf  ;;  %v506_v17 = vadd.s32 32, %v3174_v35  ;;  %v577_v2 = vsel %vm556_vm5, %v3247_v14, -inf }
 0x122   :  { %643 = vmax.xlane.f32.xlu1 %v576_v10  ;;  %v578_v10 = vsel %vm556_vm5, %v3240_v7, -inf }
 0x123   :  { %v3259_v23 = vpop.f32.mrb[6].mxu0  ;;  %v3261_v24 = vpop.f32.mrb[6].mxu1  ;;  %vm544_vm8 = vcmp.ne.s32.totalorder %v506_v17, %v3176_v36 }
 0x124   :  { %v3270_v27 = vpop.f32.mrb[7].mxu0  ;;  %v3272_v28 = vpop.f32.mrb[7].mxu1  ;;  %vm3350_vm10 = vmand %vm556_vm5, %vm544_vm8 }
 0x125   :  { %v579_v41 = vsel %vm556_vm5, %v3270_v27, -inf  ;;  %v587_v45 = vsel %vm556_vm5, %v3272_v28, -inf }
 0x126   :  { %657 = vmax.xlane.f32.xlu1 %v583_v22  ;;  %v48_v22 = vpop.permute.xlu1 %47 }
 0x127   :  { %vm90_vm6 = vcmp.eq.s32.totalorder %v48_v22, %v3185_v38 }
 0x128   :  { %v2504_v29 = vsel %vm90_vm6, 1.0, %v4127_v4 }
 0x12a   :  { %1107 = vadd.xlane.f32.xlu1 %v1089_v31 }
 0x12e   :  { %661 = vmax.xlane.f32.xlu1 %v585_v32  ;;  %v3356_v32 = vsel %vm3350_vm10, %v2504_v29, 0.0 }
 0x12f   :  { %4189 = vst [vmem:[#allocation15_spill] sm:$0xff] %v3356_v32  ;;  %v1091_v33 = vmul.f32 %v3356_v32, %v3247_v14 }
 0x132   :  { %1113 = vadd.xlane.f32.xlu1 %v1092_v39  ;;  %v580_v39 = vsel %vm556_vm5, %v3259_v23, -inf }
 0x136   :  { %649 = vmax.xlane.f32.xlu1 %v579_v41  ;;  %v588_v41 = vsel %vm556_vm5, %v3261_v24, -inf }
 0x137   :  { %956 = vrot.lane.b32.xlu0 %v3302_v42, %s2820_s18 }
 0x13a   :  { %665 = vmax.xlane.f32.xlu1 %v587_v45  ;;  %v3366_v45 = vpop.permute.xlu0 %930 }
 0x13b   :  { %4190 = vst [vmem:[#allocation16_spill] sm:$0xff] %v3366_v45 }
 0x13e   :  { %v3370_v48 = vpop.permute.xlu0 %936 }
 0x13f   :  { %4192 = vst [vmem:[#allocation18_spill] sm:$0xff] %v3370_v48 }
 0x156   :  { %1103 = vadd.xlane.f32.xlu0 %v1087_v46  ;;  %v3368_v46 = vpop.permute.xlu1 %932 }
 0x157   :  { %4191 = vst [vmem:[#allocation17_spill] sm:$0xff] %v3368_v46 }
 0x15a   :  { %659 = vmax.xlane.f32.xlu0 %v584_v54  ;;  %v3372_v54 = vpop.permute.xlu1 %934 }
 0x15e   :  { %641 = vmax.xlane.f32.xlu0 %v575_v55  ;;  %v3374_v55 = vpop.permute.xlu0 %940  ;;  %v3376_v57 = vpop.permute.xlu1 %938 }
 0x15f   :  { %4193 = vst [vmem:[#allocation19_spill] sm:$0xff] %v3374_v55 }
 0x162   :  { %1109 = vadd.xlane.f32.xlu0 %v1090_v6  ;;  %v3378_v6 = vpop.permute.xlu0 %944 }
 0x163   :  { %4194 = vst [vmem:[#allocation20_spill] sm:$0xff] %v3378_v6 }
 0x166   :  { %647 = vmax.xlane.f32.xlu0 %v578_v10  ;;  %v3380_v10 = vpop.permute.xlu1 %942  ;;  %v3382_v17 = vpop.permute.xlu0 %948 }
 0x167   :  { %4195 = vst [vmem:[#allocation21_spill] sm:$0xff] %v3380_v10  ;;  %4196 = vst [vmem:[#allocation22_spill] sm:$0xff] %v3382_v17 }
 0x16a   :  { %663 = vmax.xlane.f32.xlu0 %v586_v25  ;;  %v3384_v22 = vpop.permute.xlu1 %946  ;;  %v3386_v25 = vpop.permute.xlu0 %952 }
 0x16b   :  { %4197 = vst [vmem:[#allocation23_spill] sm:$0xff] %v3386_v25 }
 0x16e   :  { %645 = vmax.xlane.f32.xlu0 %v577_v2  ;;  %v3388_v2 = vpop.xlane.xlu0 %1168  ;;  %v3390_v29 = vpop.permute.xlu1 %950 }
 0x16f   :  { %4198 = vst [vmem:[#allocation24_spill] sm:$0xff] %v3388_v2  ;;  %4199 = vst [vmem:[#allocation25_spill] sm:$0xff] %v3390_v29 }
 0x172   :  { %1111 = vadd.xlane.f32.xlu0 %v1091_v33  ;;  %v3392_v33 = vpop.xlane.xlu0 %1170 }
 0x173   :  { %4200 = vst [vmem:[#allocation26_spill] sm:$0xff] %v3392_v33  ;;  %v514_v33 = vadd.s32 96, %v3174_v35 }
 0x176   :  { %651 = vmax.xlane.f32.xlu0 %v580_v39  ;;  %v3394_v39 = vpop.permute.xlu1 %954 }
 0x177   :  { %4201 = vst [vmem:[#allocation27_spill] sm:$0xff] %v3394_v39 }
 0x17a   :  { %667 = vmax.xlane.f32.xlu0 %v588_v41 }
 0x1a6   :  { %v640_v41 = vpop.xlane.xlu0 %639 }
 0x1a7   :  { %v3397_v4 = vmax.f32 %v3022_v53, %v640_v41  ;;  %v3399_v6 = vpop.xlane.xlu1 %1105 }
 0x1a8   :  { %4202 = vst [vmem:[#allocation28_spill] sm:$0xff] %v3399_v6 }
 0x1a9   :  { %895 = vst.msk [vmem:[#allocation3 + $0x8] sm:$0xff] %vm204_vm3, %v3397_v4  ;;  %740 = vperm.xlu1 %2709, %v3397_v4  }
 0x1aa   :  { %v656_v10 = vpop.xlane.xlu0 %655 }
 0x1ab   :  { %v3405_v25 = vmax.f32 %v3128_v15, %v656_v10  ;;  %v654_v29 = vpop.xlane.xlu1 %653  ;;  %v23_v10 = vld [vmem:[%s4124_s0 + $0x30] sm:$0xff] }
 0x1ac   :  { %v3408_v17 = vmax.f32 %v3100_v9, %v654_v29  ;;  %v27_v9 = vld [vmem:[%s4124_s0 + $0x50] sm:$0xff] }
 0x1ad   :  { %4203 = vst [vmem:[#allocation29_spill] sm:$0xff] %v3405_v25  ;;  %903 = vst.msk [vmem:[#allocation3 + $0x48] sm:$0xff] %vm204_vm3, %v3405_v25 }
 0x1ae   :  { %4204 = vst [vmem:[#allocation30_spill] sm:$0xff] %v3408_v17  ;;  %902 = vst.msk [vmem:[#allocation3 + $0x40] sm:$0xff] %vm204_vm3, %v3408_v17  ;;  %v638_v41 = vpop.xlane.xlu0 %637 }
 0x1af   :  { %v3415_v39 = vmax.f32 %v3020_v52, %v638_v41  ;;  %v644_v46 = vpop.xlane.xlu1 %643 }
 0x1b0   :  { %v3418_v55 = vmax.f32 %v3051_v60, %v644_v46  ;;  %v25_v46 = vld [vmem:[%s4124_s0 + $0x40] sm:$0xff] }
 0x1b1   :  { %894 = vst.msk [vmem:[#allocation3] sm:$0xff] %vm204_vm3, %v3415_v39  ;;  %735 = vperm.xlu1 %2709, %v3415_v39  }
 0x1b2   :  { %4205 = vst [vmem:[#allocation31_spill] sm:$0xff] %v3418_v55  ;;  %897 = vst.msk [vmem:[#allocation3 + $0x18] sm:$0xff] %vm204_vm3, %v3418_v55 }
 0x1b3   :  { %v658_v29 = vpop.xlane.xlu1 %657 }
 0x1b4   :  { %v3429_v41 = vmax.f32 %v3108_v12, %v658_v29 }
 0x1b5   :  { %53 = vperm.xlu1 %2709, %v23_v10   ;;  %v29_v10 = vld [vmem:[%s4124_s0 + $0x60] sm:$0xff] }
 0x1b6   :  { %904 = vst.msk [vmem:[#allocation3 + $0x50] sm:$0xff] %vm204_vm3, %v3429_v41 }
 0x1b7   :  { %v3436_v48 = vpop.xlane.xlu1 %1107 }
 0x1b8   :  { %4206 = vst [vmem:[#allocation32_spill] sm:$0xff] %v3436_v48 }
 0x1b9   :  { %59 = vperm.xlu1 %2709, %v25_v46   ;;  %v31_v46 = vld [vmem:[%s4124_s0 + $0x70] sm:$0xff] }
 0x1bb   :  { %v662_v15 = vpop.xlane.xlu1 %661 }
 0x1bc   :  { %v3442_v60 = vmax.f32 %v3130_v16, %v662_v15 }
 0x1bd   :  { %65 = vperm.xlu1 %2709, %v27_v9   ;;  %v32_v9 = vld [vmem:[%s4124_s0 + $0x78] sm:$0xff] }
 0x1be   :  { %4207 = vst [vmem:[#allocation33_spill] sm:$0xff] %v3442_v60  ;;  %906 = vst.msk [vmem:[#allocation3 + $0x60] sm:$0xff] %vm204_vm3, %v3442_v60 }
 0x1bf   :  { %v3449_v29 = vpop.xlane.xlu1 %1113 }
 0x1c0   :  { %4208 = vst [vmem:[#allocation34_spill] sm:$0xff] %v3449_v29 }
 0x1c1   :  { %71 = vperm.xlu1 %2709, %v29_v10  }
 0x1c3   :  { %v650_v48 = vpop.xlane.xlu1 %649 }
 0x1c4   :  { %v3455_v2 = vmax.f32 %v3078_v5, %v650_v48  ;;  %v3468_v48 = vpop.permute.xlu0 %956 }
 0x1c5   :  { %77 = vperm.xlu1 %2709, %v31_v46   ;;  %4210 = vst [vmem:[#allocation36_spill] sm:$0xff] %v3468_v48 }
 0x1c6   :  { %900 = vst.msk [vmem:[#allocation3 + $0x30] sm:$0xff] %vm204_vm3, %v3455_v2 }
 0x1c7   :  { %v666_v15 = vpop.xlane.xlu1 %665 }
 0x1c8   :  { %v3463_v29 = vmax.f32 %v3138_v19, %v666_v15 }
 0x1c9   :  { %80 = vperm.xlu1 %2709, %v32_v9  }
 0x1ca   :  { %4209 = vst [vmem:[#allocation35_spill] sm:$0xff] %v3463_v29  ;;  %908 = vst.msk [vmem:[#allocation3 + $0x70] sm:$0xff] %vm204_vm3, %v3463_v29 }
 0x1cd   :  { %775 = vperm.xlu1 %2709, %v3408_v17  }
 0x1e3   :  { %v3470_v10 = vpop.xlane.xlu0 %1103 }
 0x1e4   :  { %4211 = vst [vmem:[#allocation37_spill] sm:$0xff] %v3470_v10 }
 0x1e7   :  { %v660_v46 = vpop.xlane.xlu0 %659 }
 0x1e8   :  { %v3473_v16 = vmax.f32 %v3136_v18, %v660_v46 }
 0x1ea   :  { %4212 = vst [vmem:[#allocation38_spill] sm:$0xff] %v3473_v16  ;;  %905 = vst.msk [vmem:[#allocation3 + $0x58] sm:$0xff] %vm204_vm3, %v3473_v16 }
 0x1eb   :  { %v642_v32 = vpop.xlane.xlu0 %641 }
 0x1ec   :  { %v3478_v15 = vmax.f32 %v3076_v3, %v642_v32 }
 0x1ee   :  { %896 = vst.msk [vmem:[#allocation3 + $0x10] sm:$0xff] %vm204_vm3, %v3478_v15  ;;  %745 = vperm.xlu1 %2709, %v3478_v15  }
 0x1ef   :  { %v3483_v9 = vpop.xlane.xlu0 %1109 }
 0x1f0   :  { %4213 = vst [vmem:[#allocation39_spill] sm:$0xff] %v3483_v9 }
 0x1f2   :  { %785 = vperm.xlu1 %2709, %v3429_v41  }
 0x1f3   :  { %v648_v48 = vpop.xlane.xlu0 %647 }
 0x1f4   :  { %v3487_v46 = vmax.f32 %v3098_v8, %v648_v48  ;;  %v508_v8 = vadd.s32 48, %v3174_v35 }
 0x1f6   :  { %4214 = vst [vmem:[#allocation40_spill] sm:$0xff] %v3487_v46  ;;  %899 = vst.msk [vmem:[#allocation3 + $0x28] sm:$0xff] %vm204_vm3, %v3487_v46  ;;  %vm546_vm11 = vcmp.ne.s32.totalorder %v508_v8, %v3176_v36 }
 0x1f7   :  { %v664_v19 = vpop.xlane.xlu0 %663  ;;  %vm3528_vm14 = vmand %vm556_vm5, %vm546_vm11 }
 0x1f8   :  { %v3492_v32 = vmax.f32 %v3152_v20, %v664_v19 }
 0x1fa   :  { %4215 = vst [vmem:[#allocation41_spill] sm:$0xff] %v3492_v32  ;;  %907 = vst.msk [vmem:[#allocation3 + $0x68] sm:$0xff] %vm204_vm3, %v3492_v32 }
 0x1fb   :  { %v646_v17 = vpop.xlane.xlu0 %645 }
 0x1fc   :  { %v3497_v18 = vmax.f32 %v3072_v0, %v646_v17 }
 0x1fe   :  { %898 = vst.msk [vmem:[#allocation3 + $0x20] sm:$0xff] %vm204_vm3, %v3497_v18  ;;  %755 = vperm.xlu1 %2709, %v3497_v18  }
 0x1ff   :  { %v3502_v48 = vpop.xlane.xlu0 %1111 }
 0x200   :  { %4216 = vst [vmem:[#allocation42_spill] sm:$0xff] %v3502_v48  ;;  %v590_v48 = vsel %vm3198_vm9, %v3213_v49, -inf }
 0x202   :  { %795 = vperm.xlu1 %2709, %v3442_v60  }
 0x203   :  { %v652_v9 = vpop.xlane.xlu0 %651 }
 0x204   :  { %v3506_v19 = vmax.f32 %v3106_v11, %v652_v9 }
 0x206   :  { %4217 = vst [vmem:[#allocation43_spill] sm:$0xff] %v3506_v19  ;;  %901 = vst.msk [vmem:[#allocation3 + $0x38] sm:$0xff] %vm204_vm3, %v3506_v19  ;;  %765 = vperm.xlu1 %2709, %v3455_v2  }
 0x207   :  { %v668_v17 = vpop.xlane.xlu0 %667 }
 0x208   :  { %v3512_v20 = vmax.f32 %v3302_v42, %v668_v17 }
 0x20a   :  { %4218 = vst [vmem:[#allocation44_spill] sm:$0xff] %v3512_v20  ;;  %805 = vperm.xlu1 %2709, %v3463_v29   ;;  %909 = vst.msk [vmem:[#allocation3 + $0x78] sm:$0xff] %vm204_vm3, %v3512_v20  ;;  %v4219_v29 = vmov 0.0  }
 0x228   :  { %v741_v9 = vpop.permute.xlu1 %740 }
 0x229   :  { %v814_v60 = vsub.f32 %v590_v48, %v741_v9  ;;  %v26_v48 = vld [vmem:[%s4124_s0 + $0x48] sm:$0xff] }
 0x22a   :  { %v30_v9 = vld [vmem:[%s4124_s0 + $0x68] sm:$0xff] }
 0x22b   :  { %v831_v11 = vmul.f32 1.442695, %v814_v60 }
 0x22d   :  { %2745 = vpow2.f32 %v831_v11  ;;  %v24_v11 = vld [vmem:[%s4124_s0 + $0x38] sm:$0xff] }
 0x230   :  { %v3521_v10 = vpop.permute.xlu1 %735 }
 0x234   :  { %v54_v17 = vpop.permute.xlu1 %53 }
 0x235   :  { %vm92_vm12 = vcmp.eq.s32.totalorder %v54_v17, %v3185_v38 }
 0x236   :  { %v2506_v42 = vsel %vm92_vm12, 1.0, %v4219_v29 }
 0x237   :  { %v2746_v49 = vpop.eup %2745  ;;  %v3534_v60 = vsel %vm3528_vm14, %v2506_v42, 0.0  ;;  %v28_v42 = vld [vmem:[%s4124_s0 + $0x58] sm:$0xff]  ;;  %s2821_s0 = smov 1  }
 0x238   :  { %4222 = vst [vmem:[#allocation45_spill] sm:$0xff] %v3534_v60  ;;  %863 = vadd.xlane.f32.xlu1 %v2746_v49  ;;  %v1093_v8 = vmul.f32 %v3534_v60, %v3270_v27  ;;  %v60_v17 = vpop.permute.xlu1 %59 }
 0x239   :  { %vm94_vm1 = vcmp.eq.s32.totalorder %v60_v17, %v3185_v38 }
 0x23a   :  { %1115 = vadd.xlane.f32.xlu0 %v1093_v8 }
 0x23c   :  { %v66_v49 = vpop.permute.xlu1 %65 }
 0x23d   :  { %vm96_vm2 = vcmp.eq.s32.totalorder %v66_v49, %v3185_v38 }
 0x240   :  { %v3556_v8 = vpop.permute.xlu1 %71 }
 0x241   :  { %4223 = vst [vmem:[#allocation46_spill] sm:$0xff] %v3556_v8 }
 0x250   :  { %56 = vperm.xlu0 %2708, %v24_v11   ;;  %v3559_v11 = vpop.permute.xlu1 %77 }
 0x251   :  { %4224 = vst [vmem:[#allocation47_spill] sm:$0xff] %v3559_v11 }
 0x254   :  { %62 = vperm.xlu0 %2708, %v26_v48   ;;  %v510_v48 = vadd.s32 64, %v3174_v35 }
 0x256   :  { %vm548_vm9 = vcmp.ne.s32.totalorder %v510_v48, %v3176_v36  ;;  %v2510_v48 = vsel %vm96_vm2, 1.0, %v4219_v29 }
 0x257   :  { %vm565_vm15 = vmand %vm556_vm5, %vm548_vm9 }
 0x258   :  { %68 = vperm.xlu0 %2708, %v28_v42   ;;  %v3562_v42 = vpop.permute.xlu1 %80 }
 0x25c   :  { %74 = vperm.xlu0 %2708, %v30_v9   ;;  %v776_v9 = vpop.permute.xlu1 %775 }
 0x260   :  { %780 = vperm.xlu0 %2708, %v3405_v25   ;;  %v512_v25 = vadd.s32 80, %v3174_v35 }
 0x262   :  { %vm550_vm6 = vcmp.ne.s32.totalorder %v512_v25, %v3176_v36 }
 0x263   :  { %vm3578_vm8 = vmand %vm556_vm5, %vm550_vm6 }
 0x264   :  { %750 = vperm.xlu0 %2708, %v3418_v55   ;;  %v3586_v17 = vsel %vm3578_vm8, %v2510_v48, 0.0  ;;  %v599_v8 = vsel %vm3578_vm8, %v3237_v63, -inf }
 0x265   :  { %4228 = vst [vmem:[#allocation49_spill] sm:$0xff] %v3586_v17 }
 0x268   :  { %790 = vperm.xlu0 %2708, %v3473_v16  }
 0x26c   :  { %760 = vperm.xlu0 %2708, %v3487_v46   ;;  %v509_v46 = vadd.s32 56, %v3174_v35 }
 0x26e   :  { %vm547_vm2 = vcmp.ne.s32.totalorder %v509_v46, %v3176_v36 }
 0x26f   :  { %vm3666_vm8 = vmand %vm556_vm5, %vm547_vm2  ;;  %vm1216_vm2 = vcmask 31768  }
 0x270   :  { %800 = vperm.xlu0 %2708, %v3492_v32   ;;  %v597_v32 = vsel %vm565_vm15, %v3223_v56, -inf }
 0x271   :  { %v821_v16 = vsub.f32 %v597_v32, %v776_v9  ;;  %v3594_v9 = vpop.permute.xlu1 %745 }
 0x273   :  { %v845_v55 = vmul.f32 1.442695, %v821_v16  ;;  %v1097_v16 = vmul.f32 %v3586_v17, %v3237_v63 }
 0x274   :  { %770 = vperm.xlu0 %2708, %v3506_v19  }
 0x275   :  { %2747 = vpow2.f32 %v845_v55  ;;  %v786_v48 = vpop.permute.xlu1 %785 }
 0x278   :  { %810 = vperm.xlu0 %2708, %v3512_v20   ;;  %v2508_v20 = vsel %vm94_vm1, 1.0, %v4219_v29 }
 0x279   :  { %v3573_v19 = vsel %vm565_vm15, %v2508_v20, 0.0 }
 0x27a   :  { %4225 = vst [vmem:[#allocation48_spill] sm:$0xff] %v3573_v19  ;;  %v1095_v32 = vmul.f32 %v3573_v19, %v3223_v56  ;;  %v511_v56 = vadd.s32 72, %v3174_v35 }
 0x27c   :  { %vm549_vm11 = vcmp.ne.s32.totalorder %v511_v56, %v3176_v36 }
 0x27d   :  { %vm3604_vm12 = vmand %vm556_vm5, %vm549_vm11  ;;  %v756_v17 = vpop.permute.xlu1 %755 }
 0x27e   :  { %v598_v56 = vsel %vm3604_vm12, %v3215_v50, -inf }
 0x27f   :  { %v2748_v20 = vpop.eup %2747 }
 0x281   :  { %v796_v45 = vpop.permute.xlu1 %795 }
 0x285   :  { %v766_v31 = vpop.permute.xlu1 %765 }
 0x297   :  { %1119 = vadd.xlane.f32.xlu0 %v1095_v32 }
 0x29b   :  { %1123 = vadd.xlane.f32.xlu0 %v1097_v16  ;;  %v517_v16 = vadd.s32 120, %v3174_v35 }
 0x29f   :  { %877 = vadd.xlane.f32.xlu0 %v2748_v20  ;;  %v589_v20 = vsel %vm3190_vm7, %v3217_v51, -inf  ;;  %vm552_vm7 = vcmp.ne.s32.totalorder %v514_v33, %v3176_v36 }
 0x2a0   :  { %vm3629_vm9 = vmand %vm556_vm5, %vm552_vm7 }
 0x2c7   :  { %v3590_v55 = vpop.xlane.xlu0 %1115 }
 0x2c8   :  { %4229 = vst [vmem:[#allocation50_spill] sm:$0xff] %v3590_v55  ;;  %v813_v55 = vsub.f32 %v589_v20, %v3521_v10  ;;  %v823_v10 = vsub.f32 %v599_v8, %v786_v48  ;;  %v595_v48 = vsel %vm3528_vm14, %v3270_v27, -inf }
 0x2ca   :  { %v829_v11 = vmul.f32 1.442695, %v813_v55  ;;  %v849_v58 = vmul.f32 1.442695, %v823_v10  ;;  %v4249_v10 = vld [vmem:[#allocation13_spill] sm:$0xff] }
 0x2cf   :  { %v57_v25 = vpop.permute.xlu0 %56 }
 0x2d3   :  { %v3592_v49 = vpop.permute.xlu0 %62 }
 0x2d4   :  { %vm95_vm14 = vcmp.eq.s32.totalorder %v3592_v49, %v3185_v38 }
 0x2d7   :  { %v3597_v19 = vpop.permute.xlu0 %68 }
 0x2db   :  { %v3600_v32 = vpop.permute.xlu0 %74 }
 0x2df   :  { %v781_v60 = vpop.permute.xlu0 %780 }
 0x2e0   :  { %v822_v30 = vsub.f32 %v598_v56, %v781_v60  ;;  %v513_v60 = vadd.s32 88, %v3174_v35 }
 0x2e2   :  { %v847_v6 = vmul.f32 1.442695, %v822_v30  ;;  %v593_v30 = vsel %vm3350_vm10, %v3247_v14, -inf  ;;  %vm551_vm4 = vcmp.ne.s32.totalorder %v513_v60, %v3176_v36  ;;  %v601_v14 = vsel %vm3629_vm9, %v3252_v21, -inf  ;;  %v806_v60 = vpop.permute.xlu1 %805 }
 0x2e3   :  { %v751_v51 = vpop.permute.xlu0 %750  ;;  %v817_v44 = vsub.f32 %v593_v30, %v756_v17  ;;  %vm93_vm10 = vcmp.eq.s32.totalorder %v57_v25, %v3185_v38  ;;  %vm3642_vm15 = vmand %vm556_vm5, %vm551_vm4  ;;  %v596_v17 = vsel %vm3666_vm8, %v3259_v23, -inf  ;;  %vm101_vm4 = vcmp.eq.s32.totalorder %v3562_v42, %v3185_v38 }
 0x2e4   :  { %2749 = vpow2.f32 %v847_v6  ;;  %v816_v20 = vsub.f32 %v592_v40, %v751_v51  ;;  %v516_v6 = vadd.s32 112, %v3174_v35  ;;  %v819_v40 = vsub.f32 %v595_v48, %v766_v31 }
 0x2e5   :  { %2751 = vpow2.f32 %v829_v11  ;;  %v837_v8 = vmul.f32 1.442695, %v817_v44  ;;  %v825_v11 = vsub.f32 %v601_v14, %v796_v45  ;;  %v2507_v45 = vsel %vm93_vm10, 1.0, %v4219_v29 }
 0x2e6   :  { %v835_v56 = vmul.f32 1.442695, %v816_v20  ;;  %vm554_vm1 = vcmp.ne.s32.totalorder %v516_v6, %v3176_v36  ;;  %v600_v25 = vsel %vm3642_vm15, %v3233_v61, -inf  ;;  %v591_v44 = vsel %vm3266_vm13, %v3235_v62, -inf }
 0x2e7   :  { %v791_v33 = vpop.permute.xlu0 %790  ;;  %vm3657_vm6 = vmand %vm556_vm5, %vm554_vm1  ;;  %v853_v43 = vmul.f32 1.442695, %v825_v11  ;;  %v3675_v6 = vsel %vm3666_vm8, %v2507_v45, 0.0  ;;  %v815_v49 = vsub.f32 %v591_v44, %v3594_v9  ;;  %v2509_v14 = vsel %vm95_vm14, 1.0, %v4219_v29 }
 0x2e8   :  { %2753 = vpow2.f32 %v835_v56  ;;  %v824_v27 = vsub.f32 %v600_v25, %v791_v33  ;;  %v515_v56 = vadd.s32 104, %v3174_v35  ;;  %v841_v33 = vmul.f32 1.442695, %v819_v40 }
 0x2e9   :  { %2755 = vpow2.f32 %v849_v58  ;;  %v603_v46 = vsel %vm3657_vm6, %v3272_v28, -inf  ;;  %vm97_vm13 = vcmp.eq.s32.totalorder %v3597_v19, %v3185_v38  ;;  %v1094_v9 = vmul.f32 %v3259_v23, %v3675_v6 }
 0x2ea   :  { %2757 = vpow2.f32 %v837_v8  ;;  %v827_v31 = vsub.f32 %v603_v46, %v806_v60  ;;  %v851_v62 = vmul.f32 1.442695, %v824_v27  ;;  %vm553_vm11 = vcmp.ne.s32.totalorder %v515_v56, %v3176_v36 }
 0x2eb   :  { %v761_v51 = vpop.permute.xlu0 %760  ;;  %2759 = vpow2.f32 %v853_v43  ;;  %v3689_v11 = vsel %vm3604_vm12, %v2509_v14, 0.0  ;;  %v2511_v48 = vsel %vm97_vm13, 1.0, %v4219_v29  ;;  %v594_v19 = vsel %vm3289_vm0, %v3240_v7, -inf  ;;  %vm3697_vm7 = vmand %vm556_vm5, %vm553_vm11 }
 0x2ec   :  { %2761 = vpow2.f32 %v841_v33  ;;  %v857_v40 = vmul.f32 1.442695, %v827_v31  ;;  %v818_v45 = vsub.f32 %v594_v19, %v761_v51  ;;  %v1096_v43 = vmul.f32 %v3215_v50, %v3689_v11 }
 0x2ed   :  { %2763 = vpow2.f32 %v851_v62  ;;  %v3706_v7 = vsel %vm3642_vm15, %v2511_v48, 0.0  ;;  %v602_v34 = vsel %vm3697_vm7, %v3245_v13, -inf  ;;  %vm555_vm0 = vcmp.ne.s32.totalorder %v517_v16, %v3176_v36 }
 0x2ee   :  { %v2750_v55 = vpop.eup %2749  ;;  %v1098_v35 = vmul.f32 %v3233_v61, %v3706_v7  ;;  %vm3719_vm12 = vmand %vm556_vm5, %vm555_vm0  ;;  %vm99_vm5 = vcmp.eq.s32.totalorder %v3600_v32, %v3185_v38  ;;  %v685_v42 = vsub.f32 %v3020_v52, %v3415_v39  ;;  %vm1151_vm1 = vcmask 23568  }
 0x2ef   :  { %879 = vadd.xlane.f32.xlu1 %v2750_v55  ;;  %v2752_v20 = vpop.eup %2751  ;;  %v801_v26 = vpop.permute.xlu0 %800  ;;  %v833_v55 = vmul.f32 1.442695, %v815_v49  ;;  %v604_v61 = vsel %vm3719_vm12, %v3261_v24, -inf }
 0x2f0   :  { %v826_v60 = vsub.f32 %v602_v34, %v801_v26  ;;  %v701_v25 = vmul.f32 1.442695, %v685_v42 }
 0x2f1   :  { %2765 = vpow2.f32 %v833_v55 }
 0x2f2   :  { %v2754_v58 = vpop.eup %2753  ;;  %2767 = vpow2.f32 %v857_v40  ;;  %v855_v56 = vmul.f32 1.442695, %v826_v60  ;;  %v864_v40 = vpop.xlane.xlu1 %863 }
 0x2f3   :  { %861 = vadd.xlane.f32.xlu1 %v2752_v20  ;;  %867 = vadd.xlane.f32.xlu0 %v2754_v58  ;;  %v2756_v8 = vpop.eup %2755  ;;  %v771_v51 = vpop.permute.xlu0 %770  ;;  %v839_v20 = vmul.f32 1.442695, %v818_v45 }
 0x2f4   :  { %v2758_v27 = vpop.eup %2757  ;;  %v820_v58 = vsub.f32 %v596_v17, %v771_v51 }
 0x2f5   :  { %v2760_v50 = vpop.eup %2759  ;;  %2769 = vpow2.f32 %v839_v20 }
 0x2f6   :  { %v2762_v49 = vpop.eup %2761  ;;  %2771 = vpow2.f32 %v855_v56  ;;  %v843_v23 = vmul.f32 1.442695, %v820_v58 }
 0x2f7   :  { %1117 = vadd.xlane.f32.xlu1 %v1094_v9  ;;  %881 = vadd.xlane.f32.xlu0 %v2756_v8  ;;  %v811_v33 = vpop.permute.xlu0 %810  ;;  %v2764_v46 = vpop.eup %2763  ;;  %v686_v9 = vsub.f32 %v3022_v53, %v3397_v4  ;;  %v2513_v4 = vsel %vm99_vm5, 1.0, %v4219_v29 }
 0x2f8   :  { %v828_v30 = vsub.f32 %v604_v61, %v811_v33  ;;  %2773 = vpow2.f32 %v843_v23 }
 0x2f9   :  { %v703_v55 = vmul.f32 1.442695, %v686_v9 }
 0x2fa   :  { %v859_v36 = vmul.f32 1.442695, %v828_v30 }
 0x2fb   :  { %1121 = vadd.xlane.f32.xlu1 %v1096_v43  ;;  %869 = vadd.xlane.f32.xlu0 %v2758_v27  ;;  %v2766_v14 = vpop.eup %2765  ;;  %v3737_v43 = vsel %vm3697_vm7, %v2513_v4, 0.0  ;;  %v2515_v27 = vsel %vm101_vm4, 1.0, %v4219_v29 }
 0x2fc   :  { %v2768_v31 = vpop.eup %2767  ;;  %2775 = vpow2.f32 %v859_v36  ;;  %v3744_v34 = vsel %vm3719_vm12, %v2515_v27, 0.0 }
 0x2fd   :  { %2777 = vpow2.f32 %v703_v55  ;;  %v1102_v32 = vmul.f32 %v3261_v24, %v3744_v34  ;;  %v689_v24 = vsub.f32 %v3072_v0, %v3497_v18 }
 0x2fe   :  { %2779 = vpow2.f32 %v701_v25 }
 0x2ff   :  { %1125 = vadd.xlane.f32.xlu1 %v1098_v35  ;;  %885 = vadd.xlane.f32.xlu0 %v2760_v50  ;;  %v2770_v62 = vpop.eup %2769  ;;  %v687_v50 = vsub.f32 %v3076_v3, %v3478_v15 }
 0x300   :  { %v2772_v26 = vpop.eup %2771 }
 0x302   :  { %v2774_v8 = vpop.eup %2773 }
 0x303   :  { %873 = vadd.xlane.f32.xlu0 %v2762_v49  ;;  %883 = vadd.xlane.f32.xlu1 %v2764_v46  ;;  %v705_v49 = vmul.f32 1.442695, %v687_v50 }
 0x306   :  { %v2776_v48 = vpop.eup %2775 }
 0x307   :  { %889 = vadd.xlane.f32.xlu0 %v2768_v31  ;;  %865 = vadd.xlane.f32.xlu1 %v2766_v14  ;;  %v2778_v19 = vpop.eup %2777 }
 0x308   :  { %v975_v45 = vmul.f32 %v2778_v19, %v3331_v1  ;;  %v1100_v1 = vmul.f32 %v3245_v13, %v3737_v43  ;;  %v695_v13 = vsub.f32 %v3108_v12, %v3429_v41  ;;  %v2780_v39 = vpop.eup %2779 }
 0x309   :  { %v974_v17 = vmul.f32 %v2780_v39, %v3211_v47 }
 0x30a   :  { %v991_v16 = vadd.f32 %v975_v45, %v864_v40  ;;  %v721_v20 = vmul.f32 1.442695, %v695_v13  ;;  %v4245_v45 = vld [vmem:[#allocation46_spill] sm:$0xff] }
 0x30b   :  { %871 = vadd.xlane.f32.xlu1 %v2770_v62  ;;  %vm98_vm10 = vcmp.eq.s32.totalorder %v4245_v45, %v3185_v38 }
 0x30c   :  { %2781 = vpow2.f32 %v721_v20  ;;  %v2512_v4 = vsel %vm98_vm10, 1.0, %v4219_v29 }
 0x30f   :  { %887 = vadd.xlane.f32.xlu1 %v2772_v26 }
 0x313   :  { %875 = vadd.xlane.f32.xlu1 %v2774_v8 }
 0x316   :  { %v2782_v18 = vpop.eup %2781 }
 0x317   :  { %891 = vadd.xlane.f32.xlu1 %v2776_v48  ;;  %v4244_v48 = vld [vmem:[#allocation16_spill] sm:$0xff] }
 0x324   :  { %v3755_v51 = vpop.xlane.xlu0 %1119 }
 0x328   :  { %1024 = vrot.lane.b32.xlu1 %v991_v16, %s2821_s0  ;;  %v3759_v60 = vpop.xlane.xlu0 %1123 }
 0x34c   :  { %1129 = vadd.xlane.f32.xlu1 %v1100_v1  ;;  %v3806_v1 = vsel %vm3629_vm9, %v2512_v4, 0.0  ;;  %vm1070_vm9 = vcmask 15368  }
 0x34d   :  { %v1099_v42 = vmul.f32 %v3806_v1, %v3252_v21 }
 0x350   :  { %1133 = vadd.xlane.f32.xlu1 %v1102_v32 }
 0x354   :  { %1174 = vadd.xlane.f32.xlu1 %v3329_v59  ;;  %v709_v59 = vmul.f32 1.442695, %v689_v24  ;;  %v4248_v24 = vld [vmem:[#allocation26_spill] sm:$0xff] }
 0x356   :  { %2783 = vpow2.f32 %v709_v59  ;;  %v1201_v59 = vadd.f32 %v4248_v24, %v3022_v53 }
 0x358   :  { %1178 = vadd.xlane.f32.xlu1 %v3295_v37  ;;  %v691_v37 = vsub.f32 %v3078_v5, %v3455_v2  ;;  %v984_v2 = vmul.f32 %v2782_v18, %v3384_v22  ;;  %v4253_v18 = vld [vmem:[#allocation24_spill] sm:$0xff] }
 0x35a   :  { %v713_v41 = vmul.f32 1.442695, %v691_v37  ;;  %v4251_v37 = vld [vmem:[#allocation45_spill] sm:$0xff] }
 0x35c   :  { %1182 = vadd.xlane.f32.xlu1 %v3675_v6  ;;  %v3763_v6 = vpop.xlane.xlu0 %877  ;;  %2785 = vpow2.f32 %v713_v41 }
 0x35d   :  { %2787 = vpow2.f32 %v705_v49 }
 0x360   :  { %v2784_v33 = vpop.eup %2783 }
 0x361   :  { %v978_v47 = vmul.f32 %v2784_v33, %v3372_v54 }
 0x366   :  { %v2786_v31 = vpop.eup %2785 }
 0x367   :  { %v980_v22 = vmul.f32 %v2786_v31, %v3376_v57  ;;  %v2788_v26 = vpop.eup %2787  ;;  %v4246_v57 = vld [vmem:[#allocation47_spill] sm:$0xff] }
 0x368   :  { %v976_v54 = vmul.f32 %v2788_v26, %v4244_v48  ;;  %vm100_vm15 = vcmp.eq.s32.totalorder %v4246_v57, %v3185_v38 }
 0x369   :  { %v2514_v32 = vsel %vm100_vm15, 1.0, %v4219_v29  ;;  %v4247_v29 = vld [vmem:[#allocation28_spill] sm:$0xff] }
 0x36a   :  { %v3815_v13 = vsel %vm3657_vm6, %v2514_v32, 0.0  ;;  %v1136_v63 = vadd.f32 %v4247_v29, %v3022_v53  ;;  %v4252_v53 = vld [vmem:[#allocation37_spill] sm:$0xff] }
 0x36b   :  { %v1101_v38 = vmul.f32 %v3815_v13, %v3272_v28  ;;  %v4250_v28 = vld [vmem:[#allocation15_spill] sm:$0xff]  ;;  %v1135_v50 = vadd.f32 %v4252_v53, %v3020_v52  ;;  %v4256_v29 = vld [vmem:[#allocation49_spill] sm:$0xff] }
 0x37c   :  { %v3765_v35 = vpop.xlane.xlu1 %879 }
 0x380   :  { %v862_v56 = vpop.xlane.xlu1 %861  ;;  %v3770_v58 = vpop.xlane.xlu0 %867 }
 0x381   :  { %v990_v44 = vadd.f32 %v974_v17, %v862_v56  ;;  %v1200_v56 = vadd.f32 %v4253_v18, %v3020_v52  ;;  %v4254_v52 = vld [vmem:[#allocation48_spill] sm:$0xff] }
 0x383   :  { %1022 = vrot.lane.b32.xlu0 %v990_v44, %s2821_s0 }
 0x384   :  { %v3774_v46 = vpop.xlane.xlu1 %1117  ;;  %v882_v61 = vpop.xlane.xlu0 %881 }
 0x385   :  { %v3776_v23 = vadd.f32 %v984_v2, %v882_v61 }
 0x388   :  { %v3779_v15 = vpop.xlane.xlu1 %1121  ;;  %v870_v30 = vpop.xlane.xlu0 %869 }
 0x389   :  { %v3781_v14 = vadd.f32 %v978_v47, %v870_v30 }
 0x38c   :  { %v3783_v36 = vpop.xlane.xlu1 %1125  ;;  %v3785_v62 = vpop.xlane.xlu0 %885 }
 0x390   :  { %v3788_v9 = vpop.xlane.xlu1 %883  ;;  %v874_v8 = vpop.xlane.xlu0 %873 }
 0x391   :  { %v3790_v55 = vadd.f32 %v980_v22, %v874_v8 }
 0x394   :  { %v866_v19 = vpop.xlane.xlu1 %865  ;;  %v3835_v41 = vpop.xlane.xlu0 %889 }
 0x395   :  { %v3793_v40 = vadd.f32 %v976_v54, %v866_v19 }
 0x398   :  { %v3797_v16 = vpop.xlane.xlu1 %871 }
 0x39c   :  { %v3802_v27 = vpop.xlane.xlu1 %887 }
 0x3a0   :  { %v3811_v25 = vpop.xlane.xlu1 %875 }
 0x3a2   :  { %1127 = vadd.xlane.f32.xlu0 %v1099_v42 }
 0x3a4   :  { %v3819_v20 = vpop.xlane.xlu1 %891 }
 0x3a6   :  { %1131 = vadd.xlane.f32.xlu0 %v1101_v38 }
 0x3a8   :  { %v1025_v21 = vpop.permute.xlu1 %1024 }
 0x3a9   :  { %1072 = vst.msk [vmem:[#allocation3 + $0x8] sm:$0xff] %vm1070_vm9, %v1025_v21 }
 0x3aa   :  { %1153 = vst.msk [vmem:[#allocation3 + $0x8] sm:$0xff] %vm1151_vm1, %v1136_v63  ;;  %1172 = vadd.xlane.f32.xlu0 %v4249_v10 }
 0x3ab   :  { %1218 = vst.msk [vmem:[#allocation3 + $0x8] sm:$0xff] %vm1216_vm2, %v1201_v59 }
 0x3ae   :  { %1176 = vadd.xlane.f32.xlu0 %v4250_v28 }
 0x3b2   :  { %1180 = vadd.xlane.f32.xlu0 %v4251_v37  ;;  %v3831_v39 = vld [vmem:[#allocation3 + $0x8] sm:$0xff] }
 0x3b3   :  { %2789 = vlog2.f32 %v3831_v39  ;;  %vm2031_vm6 = vcmp.gt.f32.partialorder %v3831_v39, 0.0 }
 0x3bd   :  { %v2790_v44 = vpop.eup %2789 }
 0x3be   :  { %v1870_v2 = vmul.f32 0.6931472, %v2790_v44 }
 0x3c8   :  { %2240 = vrot.lane.b32.xlu0 %v3831_v39, %s2820_s18 }
 0x3d9   :  { %v3854_v47 = vpop.xlane.xlu1 %1129 }
 0x3dd   :  { %v3856_v30 = vpop.xlane.xlu1 %1133 }
 0x3e1   :  { %v3860_v22 = vpop.xlane.xlu1 %1174 }
 0x3e5   :  { %v3864_v8 = vpop.xlane.xlu1 %1178 }
 0x3e9   :  { %v3868_v54 = vpop.xlane.xlu1 %1182 }
 0x3f5   :  { %v1023_v17 = vpop.permute.xlu0 %1022 }
 0x3f6   :  { %1071 = vst.msk [vmem:[#allocation3] sm:$0xff] %vm1070_vm9, %v1023_v17 }
 0x3f7   :  { %1152 = vst.msk [vmem:[#allocation3] sm:$0xff] %vm1151_vm1, %v1135_v50 }
 0x3f8   :  { %1217 = vst.msk [vmem:[#allocation3] sm:$0xff] %vm1216_vm2, %v1200_v56 }
 0x3ff   :  { %v3845_v49 = vld [vmem:[#allocation3] sm:$0xff] }
 0x400   :  { %2238 = vrot.lane.b32.xlu1 %v3845_v49, %s2820_s18  ;;  %2791 = vlog2.f32 %v3845_v49  ;;  %vm2030_vm14 = vcmp.gt.f32.partialorder %v3845_v49, 0.0 }
 0x404   :  { %1917 = vrot.lane.b32.xlu1 %v1870_v2, %s2820_s18 }
 0x40a   :  { %v2792_v33 = vpop.eup %2791 }
 0x40b   :  { %v1868_v61 = vmul.f32 0.6931472, %v2792_v33  ;;  %v4258_v33 = vld [vmem:[#allocation5_spill] sm:$0xff] }
 0x40d   :  { %1915 = vrot.lane.b32.xlu0 %v1868_v61, %s2820_s18 }
 0x428   :  { %1186 = vadd.xlane.f32.xlu1 %v3689_v11 }
 0x42c   :  { %1184 = vadd.xlane.f32.xlu0 %v4254_v52 }
 0x42f   :  { %v3858_v31 = vpop.xlane.xlu0 %1127 }
 0x433   :  { %v3862_v26 = vpop.xlane.xlu0 %1131 }
 0x434   :  { %4255 = vst [vmem:[#allocation16_spill] sm:$0xff] %v3862_v26 }
 0x437   :  { %v3866_v48 = vpop.xlane.xlu0 %1172 }
 0x43b   :  { %v3870_v19 = vpop.xlane.xlu0 %1176 }
 0x43f   :  { %v3872_v45 = vpop.xlane.xlu0 %1180 }
 0x443   :  { %v2241_v32 = vpop.permute.xlu0 %2240 }
 0x444   :  { %2793 = vrcp.f32 %v2241_v32  ;;  %v4261_v32 = vld [vmem:[#allocation31_spill] sm:$0xff] }
 0x44e   :  { %v2794_v50 = vpop.eup %2793 }
 0x472   :  { %v2239_v11 = vpop.permute.xlu1 %2238 }
 0x473   :  { %2795 = vrcp.f32 %v2239_v11  ;;  %v4259_v11 = vld [vmem:[#allocation43_spill] sm:$0xff] }
 0x476   :  { %v1918_v4 = vpop.permute.xlu1 %1917 }
 0x477   :  { %v1964_v57 = vadd.f32 %v1918_v4, %v3831_v39  ;;  %v4260_v4 = vld [vmem:[#allocation7_spill] sm:$0xff] }
 0x479   :  { %2080 = vrot.lane.b32.xlu1 %v1964_v57, %s2822_s7  ;;  %v692_v57 = vsub.f32 %v4260_v4, %v4259_v11 }
 0x47d   :  { %v2796_v2 = vpop.eup %2795 }
 0x47f   :  { %v1916_v42 = vpop.permute.xlu0 %1915 }
 0x480   :  { %v1963_v38 = vadd.f32 %v1916_v42, %v3845_v49  ;;  %v4262_v42 = vld [vmem:[#allocation4_spill] sm:$0xff] }
 0x482   :  { %2078 = vrot.lane.b32.xlu0 %v1963_v38, %s2822_s7  ;;  %v688_v38 = vsub.f32 %v4262_v42, %v4261_v32  ;;  %v4272_v32 = vld [vmem:[#allocation14_spill] sm:$0xff] }
 0x49d   :  { %1190 = vadd.xlane.f32.xlu1 %v3706_v7 }
 0x4a1   :  { %1188 = vadd.xlane.f32.xlu0 %v4256_v29  ;;  %v4263_v29 = vld [vmem:[#allocation29_spill] sm:$0xff] }
 0x4b5   :  { %v3878_v63 = vpop.xlane.xlu1 %1186 }
 0x4b9   :  { %v3882_v59 = vpop.xlane.xlu0 %1184 }
 0x4eb   :  { %v2081_v21 = vpop.permute.xlu1 %2080 }
 0x4ec   :  { %v2127_v24 = vmul.f32 %v2081_v21, %v3831_v39  ;;  %v4264_v21 = vld [vmem:[#allocation8_spill] sm:$0xff] }
 0x4ee   :  { %2160 = vrot.lane.b32.xlu0 %v2127_v24, %s2820_s18  ;;  %v694_v24 = vsub.f32 %v4264_v21, %v4263_v29 }
 0x4f4   :  { %v2079_v10 = vpop.permute.xlu0 %2078 }
 0x4f5   :  { %v2126_v28 = vmul.f32 %v2079_v10, %v3845_v49  ;;  %v715_v10 = vmul.f32 1.442695, %v692_v57  ;;  %v4271_v57 = vld [vmem:[#allocation44_spill] sm:$0xff] }
 0x4f7   :  { %2158 = vrot.lane.b32.xlu1 %v2126_v28, %s2820_s18  ;;  %v707_v28 = vmul.f32 1.442695, %v688_v38  ;;  %v700_v38 = vsub.f32 %v4272_v32, %v4271_v57  ;;  %v4277_v57 = vld [vmem:[#allocation17_spill] sm:$0xff]  ;;  %s2824_s18 = smov 125  }
 0x50d   :  { %1192 = vadd.xlane.f32.xlu0 %v3806_v1 }
 0x51b   :  { %1194 = vadd.xlane.f32.xlu1 %v3737_v43  ;;  %v4257_v43 = vld [vmem:[#allocation40_spill] sm:$0xff] }
 0x51c   :  { %v690_v61 = vsub.f32 %v4258_v33, %v4257_v43  ;;  %v4270_v43 = vld [vmem:[#allocation6_spill] sm:$0xff] }
 0x51e   :  { %v711_v52 = vmul.f32 1.442695, %v690_v61 }
 0x520   :  { %2797 = vpow2.f32 %v711_v52 }
 0x521   :  { %2799 = vpow2.f32 %v715_v10 }
 0x522   :  { %2801 = vpow2.f32 %v707_v28 }
 0x52a   :  { %v3891_v18 = vpop.xlane.xlu1 %1190  ;;  %v2798_v11 = vpop.eup %2797 }
 0x52e   :  { %v3888_v7 = vpop.xlane.xlu0 %1188 }
 0x560   :  { %v2161_v37 = vpop.permute.xlu0 %2160 }
 0x561   :  { %v2207_v53 = vsub.f32 %v3831_v39, %v2161_v37  ;;  %v719_v37 = vmul.f32 1.442695, %v694_v24  ;;  %v4273_v24 = vld [vmem:[#allocation18_spill] sm:$0xff]  ;;  %v1202_v39 = vadd.f32 %v3866_v48, %v3076_v3 }
 0x562   :  { %v979_v10 = vmul.f32 %v2798_v11, %v4273_v24 }
 0x563   :  { %v2289_v17 = vmul.f32 %v2794_v50, %v2207_v53  ;;  %v4265_v53 = vld [vmem:[#allocation38_spill] sm:$0xff]  ;;  %2803 = vpow2.f32 %v719_v37 }
 0x564   :  { %v4266_v50 = vld [vmem:[#allocation10_spill] sm:$0xff]  ;;  %v995_v37 = vadd.f32 %v979_v10, %v3797_v16  ;;  %v4278_v16 = vld [vmem:[#allocation35_spill] sm:$0xff] }
 0x565   :  { %2336 = vrot.lane.b32.xlu0 %v2289_v17, %s2821_s0 }
 0x569   :  { %v2159_v56 = vpop.permute.xlu1 %2158 }
 0x56a   :  { %v2206_v44 = vsub.f32 %v3845_v49, %v2159_v56  ;;  %v4267_v56 = vld [vmem:[#allocation41_spill] sm:$0xff]  ;;  %v4288_v49 = vld [vmem:[#allocation34_spill] sm:$0xff] }
 0x56c   :  { %v2287_v1 = vmul.f32 %v2796_v2, %v2206_v44  ;;  %v4268_v44 = vld [vmem:[#allocation12_spill] sm:$0xff] }
 0x56d   :  { %v698_v2 = vsub.f32 %v4268_v44, %v4267_v56  ;;  %v4275_v56 = vld [vmem:[#allocation9_spill] sm:$0xff] }
 0x56e   :  { %2334 = vrot.lane.b32.xlu1 %v2287_v1, %s2821_s0  ;;  %v4269_v1 = vld [vmem:[#allocation30_spill] sm:$0xff] }
 0x56f   :  { %v693_v61 = vsub.f32 %v4270_v43, %v4269_v1  ;;  %v727_v52 = vmul.f32 1.442695, %v698_v2  ;;  %v4276_v2 = vld [vmem:[#allocation19_spill] sm:$0xff] }
 0x571   :  { %v717_v29 = vmul.f32 1.442695, %v693_v61 }
 0x584   :  { %1196 = vadd.xlane.f32.xlu0 %v3815_v13  ;;  %v696_v13 = vsub.f32 %v4266_v50, %v4265_v53  ;;  %v731_v53 = vmul.f32 1.442695, %v700_v38 }
 0x586   :  { %v723_v17 = vmul.f32 1.442695, %v696_v13  ;;  %v4274_v13 = vld [vmem:[#allocation33_spill] sm:$0xff] }
 0x588   :  { %2805 = vpow2.f32 %v723_v17  ;;  %v697_v17 = vsub.f32 %v4275_v56, %v4274_v13 }
 0x589   :  { %2807 = vpow2.f32 %v727_v52  ;;  %v4279_v52 = vld [vmem:[#allocation11_spill] sm:$0xff] }
 0x58a   :  { %2809 = vpow2.f32 %v717_v29  ;;  %v725_v26 = vmul.f32 1.442695, %v697_v17  ;;  %v699_v38 = vsub.f32 %v4279_v52, %v4278_v16  ;;  %v4280_v29 = vld [vmem:[#allocation20_spill] sm:$0xff]  ;;  %v4285_v16 = vld [vmem:[#allocation25_spill] sm:$0xff] }
 0x58b   :  { %2811 = vpow2.f32 %v731_v53 }
 0x58c   :  { %2813 = vpow2.f32 %v725_v26 }
 0x592   :  { %1198 = vadd.xlane.f32.xlu1 %v3744_v34  ;;  %v2800_v34 = vpop.eup %2799 }
 0x593   :  { %v2802_v28 = vpop.eup %2801  ;;  %v981_v1 = vmul.f32 %v2800_v34, %v4276_v2  ;;  %v4282_v2 = vld [vmem:[#allocation23_spill] sm:$0xff] }
 0x594   :  { %v2804_v61 = vpop.eup %2803  ;;  %v977_v11 = vmul.f32 %v2802_v28, %v4277_v57  ;;  %v729_v28 = vmul.f32 1.442695, %v699_v38 }
 0x595   :  { %v997_v24 = vadd.f32 %v981_v1, %v3811_v25  ;;  %v983_v10 = vmul.f32 %v2804_v61, %v4280_v29  ;;  %v2806_v13 = vpop.eup %2805  ;;  %v4286_v29 = vld [vmem:[#allocation27_spill] sm:$0xff] }
 0x596   :  { %2815 = vpow2.f32 %v729_v28 }
 0x597   :  { %v999_v34 = vadd.f32 %v983_v10, %v3765_v35  ;;  %v4283_v35 = vld [vmem:[#allocation21_spill] sm:$0xff] }
 0x59a   :  { %1026 = vrot.lane.b32.xlu0 %v3793_v40, %s2821_s0  ;;  %v993_v40 = vadd.f32 %v977_v11, %v3770_v58  ;;  %v2808_v58 = vpop.eup %2807 }
 0x59b   :  { %v2810_v53 = vpop.eup %2809  ;;  %v987_v1 = vmul.f32 %v2808_v58, %v4282_v2 }
 0x59c   :  { %v2812_v61 = vpop.eup %2811  ;;  %v982_v26 = vmul.f32 %v2810_v53, %v4283_v35  ;;  %v4287_v53 = vld [vmem:[#allocation32_spill] sm:$0xff]  ;;  %v1205_v35 = vadd.f32 %v3864_v8, %v4258_v33  ;;  %v1144_v8 = vadd.f32 %v3779_v15, %v4264_v21  ;;  %v1146_v15 = vadd.f32 %v3783_v36, %v4266_v50 }
 0x59d   :  { %v1003_v57 = vadd.f32 %v987_v1, %v3802_v27  ;;  %v1140_v1 = vadd.f32 %v4288_v49, %v4258_v33  ;;  %v1148_v36 = vadd.f32 %v3854_v47, %v4268_v44  ;;  %v1150_v47 = vadd.f32 %v3856_v30, %v4272_v32 }
 0x59e   :  { %1032 = vrot.lane.b32.xlu0 %v995_v37, %s2821_s0  ;;  %v4281_v37 = vld [vmem:[#allocation22_spill] sm:$0xff]  ;;  %v998_v11 = vadd.f32 %v982_v26, %v3763_v6  ;;  %v2823_v6 = vmov -0.0|-0.0   ;;  %v1207_v26 = vadd.f32 %v3868_v54, %v4260_v4 }
 0x59f   :  { %v985_v25 = vmul.f32 %v2806_v13, %v4281_v37 }
 0x5a1   :  { %v1001_v17 = vadd.f32 %v985_v25, %v3788_v9  ;;  %v2814_v9 = vpop.eup %2813 }
 0x5a2   :  { %1036 = vrot.lane.b32.xlu0 %v997_v24, %s2821_s0  ;;  %v4284_v24 = vld [vmem:[#allocation36_spill] sm:$0xff]  ;;  %v986_v38 = vmul.f32 %v2814_v9, %v4285_v16  ;;  %v1204_v9 = vadd.f32 %v3870_v19, %v3072_v0  ;;  %v1206_v19 = vadd.f32 %v3872_v45, %v3078_v5  ;;  %v1208_v45 = vadd.f32 %v3882_v59, %v4270_v43 }
 0x5a3   :  { %1028 = vrot.lane.b32.xlu1 %v993_v40, %s2821_s0 }
 0x5a4   :  { %v1002_v27 = vadd.f32 %v986_v38, %v3785_v62 }
 0x5a6   :  { %1040 = vrot.lane.b32.xlu0 %v999_v34, %s2821_s0 }
 0x5a7   :  { %1030 = vrot.lane.b32.xlu1 %v3781_v14, %s2821_s0  ;;  %v989_v14 = vmul.f32 %v2812_v61, %v4284_v24 }
 0x5a8   :  { %v1195_v28 = vpop.xlane.xlu1 %1194 }
 0x5a9   :  { %v1005_v40 = vadd.f32 %v989_v14, %v3819_v20  ;;  %v3956_v20 = vpop.xlane.xlu0 %1192  ;;  %v4290_v14 = vld [vmem:[#allocation42_spill] sm:$0xff] }
 0x5aa   :  { %1044 = vrot.lane.b32.xlu0 %v1001_v17, %s2821_s0  ;;  %v1137_v17 = vadd.f32 %v4287_v53, %v3076_v3  ;;  %v1142_v3 = vadd.f32 %v3774_v46, %v4260_v4  ;;  %v4289_v46 = vld [vmem:[#allocation39_spill] sm:$0xff]  ;;  %v1203_v4 = vadd.f32 %v3860_v22, %v4262_v42  ;;  %v1139_v22 = vadd.f32 %v4290_v14, %v3072_v0 }
 0x5ab   :  { %1034 = vrot.lane.b32.xlu1 %v3790_v55, %s2821_s0  ;;  %v2816_v55 = vpop.eup %2815  ;;  %v1138_v24 = vadd.f32 %v4289_v46, %v4262_v42 }
 0x5ac   :  { %v988_v10 = vmul.f32 %v2816_v55, %v4286_v29  ;;  %v1143_v55 = vadd.f32 %v3755_v51, %v4270_v43  ;;  %v1145_v51 = vadd.f32 %v3759_v60, %v3108_v12  ;;  %v1210_v29 = vadd.f32 %v3888_v7, %v3108_v12 }
 0x5ad   :  { %v1147_v12 = vadd.f32 %v3858_v31, %v4275_v56  ;;  %v4292_v31 = vld [vmem:[#allocation16_spill] sm:$0xff] }
 0x5ae   :  { %1048 = vrot.lane.b32.xlu0 %v1003_v57, %s2821_s0  ;;  %v1004_v13 = vadd.f32 %v988_v10, %v3835_v41  ;;  %v1212_v10 = vadd.f32 %v3956_v20, %v4275_v56 }
 0x5af   :  { %1038 = vrot.lane.b32.xlu1 %v998_v11, %s2821_s0  ;;  %v1209_v11 = vadd.f32 %v3878_v63, %v4264_v21  ;;  %v1211_v21 = vadd.f32 %v3891_v18, %v4266_v50  ;;  %v1213_v50 = vadd.f32 %v1195_v28, %v4268_v44 }
 0x5b2   :  { %1052 = vrot.lane.b32.xlu0 %v1005_v40, %s2821_s0  ;;  %v4291_v40 = vld [vmem:[#allocation50_spill] sm:$0xff] }
 0x5b3   :  { %1042 = vrot.lane.b32.xlu1 %v3776_v23, %s2821_s0  ;;  %v1141_v16 = vadd.f32 %v4291_v40, %v3078_v5 }
 0x5b6   :  { %2716 = vrot.lane.b32.xlu0 %v2823_v6, %s2824_s18 }
 0x5b7   :  { %1046 = vrot.lane.b32.xlu1 %v1002_v27, %s2821_s0 }
 0x5ba   :  { %2726 = vrot.lane.b32.xlu0 %v2823_v6, %s2824_s18 }
 0x5bb   :  { %1050 = vrot.lane.b32.xlu1 %v1004_v13, %s2821_s0  ;;  %v1149_v13 = vadd.f32 %v4292_v31, %v4279_v52 }
 0x5bf   :  { %2711 = vrot.lane.b32.xlu1 %v2823_v6, %s2824_s18 }
 0x5c3   :  { %2721 = vrot.lane.b32.xlu1 %v2823_v6, %s2824_s18 }
 0x5c7   :  { %2731 = vrot.lane.b32.xlu1 %v2823_v6, %s2824_s18 }
 0x5d7   :  { %v2337_v23 = vpop.permute.xlu0 %2336 }
 0x5d8   :  { %v2383_v62 = vsel %vm2031_vm6, %v2337_v23, 0.0 }
 0x5d9   :  { %v2399_v34 = vmul.f32 -1.0, %v2383_v62 }
 0x5db   :  { %2432 = vrot.lane.b32.xlu0 %v2399_v34, %s2824_s18 }
 0x5df   :  { %2736 = vrot.lane.b32.xlu0 %v2823_v6, %s2824_s18 }
 0x5e0   :  { %v2335_v37 = vpop.permute.xlu1 %2334 }
 0x5e1   :  { %v2382_v41 = vsel %vm2030_vm14, %v2335_v37, 0.0 }
 0x5e2   :  { %v2398_v25 = vmul.f32 -1.0, %v2382_v41 }
 0x5e4   :  { %2430 = vrot.lane.b32.xlu1 %v2398_v25, %s2824_s18 }
 0x5e8   :  { %2741 = vrot.lane.b32.xlu1 %v2823_v6, %s2824_s18 }
 0x611   :  { %v3960_v58 = vpop.xlane.xlu0 %1196 }
 0x612   :  { %v1214_v20 = vadd.f32 %v3960_v58, %v4279_v52 }
 0x615   :  { %v1027_v2 = vpop.permute.xlu0 %1026 }
 0x616   :  { %1073 = vst.msk [vmem:[#allocation3 + $0x10] sm:$0xff] %vm1070_vm9, %v1027_v2 }
 0x617   :  { %1154 = vst.msk [vmem:[#allocation3 + $0x10] sm:$0xff] %vm1151_vm1, %v1137_v17 }
 0x618   :  { %1219 = vst.msk [vmem:[#allocation3 + $0x10] sm:$0xff] %vm1216_vm2, %v1202_v39 }
 0x619   :  { %v1033_v61 = vpop.permute.xlu0 %1032 }
 0x61a   :  { %1076 = vst.msk [vmem:[#allocation3 + $0x28] sm:$0xff] %vm1070_vm9, %v1033_v61 }
 0x61b   :  { %1157 = vst.msk [vmem:[#allocation3 + $0x28] sm:$0xff] %vm1151_vm1, %v1140_v1 }
 0x61c   :  { %1222 = vst.msk [vmem:[#allocation3 + $0x28] sm:$0xff] %vm1216_vm2, %v1205_v35 }
 0x61d   :  { %v1037_v48 = vpop.permute.xlu0 %1036 }
 0x61e   :  { %1078 = vst.msk [vmem:[#allocation3 + $0x38] sm:$0xff] %vm1070_vm9, %v1037_v48 }
 0x61f   :  { %1159 = vst.msk [vmem:[#allocation3 + $0x38] sm:$0xff] %vm1151_vm1, %v1142_v3  ;;  %v1199_v57 = vpop.xlane.xlu1 %1198 }
 0x620   :  { %1224 = vst.msk [vmem:[#allocation3 + $0x38] sm:$0xff] %vm1216_vm2, %v1207_v26  ;;  %v1215_v38 = vadd.f32 %v1199_v57, %v4272_v32 }
 0x621   :  { %v1041_v33 = vpop.permute.xlu0 %1040 }
 0x622   :  { %1080 = vst.msk [vmem:[#allocation3 + $0x48] sm:$0xff] %vm1070_vm9, %v1041_v33 }
 0x623   :  { %1161 = vst.msk [vmem:[#allocation3 + $0x48] sm:$0xff] %vm1151_vm1, %v1144_v8  ;;  %v1029_v54 = vpop.permute.xlu1 %1028 }
 0x624   :  { %1226 = vst.msk [vmem:[#allocation3 + $0x48] sm:$0xff] %vm1216_vm2, %v1209_v11 }
 0x625   :  { %1074 = vst.msk [vmem:[#allocation3 + $0x18] sm:$0xff] %vm1070_vm9, %v1029_v54  ;;  %v1045_v63 = vpop.permute.xlu0 %1044 }
 0x626   :  { %1155 = vst.msk [vmem:[#allocation3 + $0x18] sm:$0xff] %vm1151_vm1, %v1138_v24 }
 0x627   :  { %1220 = vst.msk [vmem:[#allocation3 + $0x18] sm:$0xff] %vm1216_vm2, %v1203_v4  ;;  %v1031_v42 = vpop.permute.xlu1 %1030 }
 0x628   :  { %1082 = vst.msk [vmem:[#allocation3 + $0x58] sm:$0xff] %vm1070_vm9, %v1045_v63  ;;  %1075 = vst.msk [vmem:[#allocation3 + $0x20] sm:$0xff] %vm1070_vm9, %v1031_v42 }
 0x629   :  { %1163 = vst.msk [vmem:[#allocation3 + $0x58] sm:$0xff] %vm1151_vm1, %v1146_v15  ;;  %1156 = vst.msk [vmem:[#allocation3 + $0x20] sm:$0xff] %vm1151_vm1, %v1139_v22  ;;  %v1049_v18 = vpop.permute.xlu0 %1048 }
 0x62a   :  { %1228 = vst.msk [vmem:[#allocation3 + $0x58] sm:$0xff] %vm1216_vm2, %v1211_v21  ;;  %1221 = vst.msk [vmem:[#allocation3 + $0x20] sm:$0xff] %vm1216_vm2, %v1204_v9 }
 0x62b   :  { %1084 = vst.msk [vmem:[#allocation3 + $0x68] sm:$0xff] %vm1070_vm9, %v1049_v18  ;;  %v1035_v0 = vpop.permute.xlu1 %1034 }
 0x62c   :  { %1165 = vst.msk [vmem:[#allocation3 + $0x68] sm:$0xff] %vm1151_vm1, %v1148_v36 }
 0x62d   :  { %1230 = vst.msk [vmem:[#allocation3 + $0x68] sm:$0xff] %vm1216_vm2, %v1213_v50  ;;  %v1053_v44 = vpop.permute.xlu0 %1052 }
 0x62e   :  { %1077 = vst.msk [vmem:[#allocation3 + $0x30] sm:$0xff] %vm1070_vm9, %v1035_v0  ;;  %1086 = vst.msk [vmem:[#allocation3 + $0x78] sm:$0xff] %vm1070_vm9, %v1053_v44 }
 0x62f   :  { %1158 = vst.msk [vmem:[#allocation3 + $0x30] sm:$0xff] %vm1151_vm1, %v1141_v16  ;;  %1167 = vst.msk [vmem:[#allocation3 + $0x78] sm:$0xff] %vm1151_vm1, %v1150_v47  ;;  %v1039_v5 = vpop.permute.xlu1 %1038 }
 0x630   :  { %1223 = vst.msk [vmem:[#allocation3 + $0x30] sm:$0xff] %vm1216_vm2, %v1206_v19  ;;  %1232 = vst.msk [vmem:[#allocation3 + $0x78] sm:$0xff] %vm1216_vm2, %v1215_v38 }
 0x631   :  { %1079 = vst.msk [vmem:[#allocation3 + $0x40] sm:$0xff] %vm1070_vm9, %v1039_v5  ;;  %v2717_v30 = vpop.permute.xlu0 %2716 }
 0x632   :  { %1160 = vst.msk [vmem:[#allocation3 + $0x40] sm:$0xff] %vm1151_vm1, %v1143_v55  ;;  %v2719_v32 = vunpack.i.h.bf16 %v2717_v30  ;;  %v2718_v27 = vunpack.i.l.bf16 %v2717_v30 }
 0x633   :  { %1225 = vst.msk [vmem:[#allocation3 + $0x40] sm:$0xff] %vm1216_vm2, %v1208_v45  ;;  %v1043_v6 = vpop.permute.xlu1 %1042 }
 0x634   :  { %1081 = vst.msk [vmem:[#allocation3 + $0x50] sm:$0xff] %vm1070_vm9, %v1043_v6 }
 0x635   :  { %2484 = vst.msk [vmem:[%s4126_s4 + $0x28] sm:$0xff] %vm204_vm3, %v2719_v32  ;;  %2483 = vst.msk [vmem:[%s4126_s4 + $0x20] sm:$0xff] %vm204_vm3, %v2718_v27  ;;  %v2727_v59 = vpop.permute.xlu0 %2726 }
 0x636   :  { %1162 = vst.msk [vmem:[#allocation3 + $0x50] sm:$0xff] %vm1151_vm1, %v1145_v51  ;;  %v2729_v60 = vunpack.i.h.bf16 %v2727_v59  ;;  %v2728_v43 = vunpack.i.l.bf16 %v2727_v59 }
 0x637   :  { %1227 = vst.msk [vmem:[#allocation3 + $0x50] sm:$0xff] %vm1216_vm2, %v1210_v29  ;;  %v1047_v7 = vpop.permute.xlu1 %1046 }
 0x638   :  { %1083 = vst.msk [vmem:[#allocation3 + $0x60] sm:$0xff] %vm1070_vm9, %v1047_v7 }
 0x639   :  { %2488 = vst.msk [vmem:[%s4126_s4 + $0x48] sm:$0xff] %vm204_vm3, %v2729_v60  ;;  %2487 = vst.msk [vmem:[%s4126_s4 + $0x40] sm:$0xff] %vm204_vm3, %v2728_v43 }
 0x63a   :  { %1164 = vst.msk [vmem:[#allocation3 + $0x60] sm:$0xff] %vm1151_vm1, %v1147_v12 }
 0x63b   :  { %1229 = vst.msk [vmem:[#allocation3 + $0x60] sm:$0xff] %vm1216_vm2, %v1212_v10  ;;  %v1051_v56 = vpop.permute.xlu1 %1050 }
 0x63c   :  { %1085 = vst.msk [vmem:[#allocation3 + $0x70] sm:$0xff] %vm1070_vm9, %v1051_v56 }
 0x63d   :  { %1166 = vst.msk [vmem:[#allocation3 + $0x70] sm:$0xff] %vm1151_vm1, %v1149_v13 }
 0x63e   :  { %1231 = vst.msk [vmem:[#allocation3 + $0x70] sm:$0xff] %vm1216_vm2, %v1214_v20 }
 0x63f   :  { %v2712_v23 = vpop.permute.xlu1 %2711 }
 0x640   :  { %v2714_v62 = vunpack.i.h.bf16 %v2712_v23  ;;  %v2713_v34 = vunpack.i.l.bf16 %v2712_v23 }
 0x642   :  { %2482 = vst.msk [vmem:[%s4126_s4 + $0x18] sm:$0xff] %vm204_vm3, %v2714_v62  ;;  %2481 = vst.msk [vmem:[%s4126_s4 + $0x10] sm:$0xff] %vm204_vm3, %v2713_v34 }
 0x643   :  { %v2722_v52 = vpop.permute.xlu1 %2721 }
 0x644   :  { %v2724_v28 = vunpack.i.h.bf16 %v2722_v52  ;;  %v2723_v37 = vunpack.i.l.bf16 %v2722_v52 }
 0x646   :  { %2486 = vst.msk [vmem:[%s4126_s4 + $0x38] sm:$0xff] %vm204_vm3, %v2724_v28  ;;  %2485 = vst.msk [vmem:[%s4126_s4 + $0x30] sm:$0xff] %vm204_vm3, %v2723_v37 }
 0x647   :  { %v2732_v41 = vpop.permute.xlu1 %2731 }
 0x648   :  { %v2734_v25 = vunpack.i.h.bf16 %v2732_v41  ;;  %v2733_v58 = vunpack.i.l.bf16 %v2732_v41 }
 0x64a   :  { %2490 = vst.msk [vmem:[%s4126_s4 + $0x58] sm:$0xff] %vm204_vm3, %v2734_v25  ;;  %2489 = vst.msk [vmem:[%s4126_s4 + $0x50] sm:$0xff] %vm204_vm3, %v2733_v58 }
 0x64d   :  { %v2433_v53 = vpop.permute.xlu0 %2432 }
 0x64e   :  { %2480 = vst.msk [vmem:[%s4126_s4 + $0x8] sm:$0xff] %vm204_vm3, %v2433_v53 }
 0x651   :  { %v2737_v17 = vpop.permute.xlu0 %2736 }
 0x652   :  { %v2739_v2 = vunpack.i.h.bf16 %v2737_v17  ;;  %v2738_v39 = vunpack.i.l.bf16 %v2737_v17 }
 0x654   :  { %2492 = vst.msk [vmem:[%s4126_s4 + $0x68] sm:$0xff] %vm204_vm3, %v2739_v2  ;;  %2491 = vst.msk [vmem:[%s4126_s4 + $0x60] sm:$0xff] %vm204_vm3, %v2738_v39 }
 0x656   :  { %v2431_v49 = vpop.permute.xlu1 %2430 }
 0x657   :  { %2479 = vst.msk [vmem:[%s4126_s4] sm:$0xff] %vm204_vm3, %v2431_v49 }
 0x65a   :  { %v2742_v1 = vpop.permute.xlu1 %2741 }
 0x65b   :  { %v2744_v61 = vunpack.i.h.bf16 %v2742_v1  ;;  %v2743_v35 = vunpack.i.l.bf16 %v2742_v1 }
 0x65d   :  { %2494 = vst.msk [vmem:[%s4126_s4 + $0x78] sm:$0xff] %vm204_vm3, %v2744_v61  ;;  %2493 = vst.msk [vmem:[%s4126_s4 + $0x70] sm:$0xff] %vm204_vm3, %v2743_v35 }

</bundles_post_ra>
